<compile_context>
chip_gen: v6e
topology: v6e:2x2x1
jax: 0.10.0
libtpu: 0.0.40
codegen_flags: <defaults>
</compile_context>

<pallas_src>
import functools

import jax
import jax.numpy as jnp
from jax.experimental import pallas as pl
from jax.experimental.pallas import tpu as pltpu


def _resize_conv2x_kernel(x_ref, w_ref, b_ref, o_ref):
    # x_ref: (1, 1, TH+2, W+2, Cin)  zero/halo-padded ORIGINAL-resolution NHWC row tile
    # w_ref: (9*Cin, 4*Cout)         phase-folded weights, K ordered (ky, kx, ci),
    #                                N ordered (py, px, co)
    # b_ref: (1, 4*Cout)             bias replicated per phase
    # o_ref: (1, 1, TH*W, 4*Cout)    per-phase output (pixel-shuffled by wrapper)
    _, _, thp2, wp2, cin = x_ref.shape
    TH, W = thp2 - 2, wp2 - 2

    x = x_ref[0, 0]  # (TH+2, W+2, Cin) — single load, then value slices

    # im2col once per tile, then ONE MXU matmul with K = 9*Cin
    # (replaces 9 tiny K=Cin matmuls + 9 slice/reshape/matmul round trips).
    patches = jnp.concatenate(
        [x[ky:ky + TH, kx:kx + W, :] for ky in range(3) for kx in range(3)],
        axis=-1)                                     # (TH, W, 9*Cin)
    patches = patches.reshape(TH * W, 9 * cin)       # (TH*W, 9*Cin)

    acc = jnp.dot(patches, w_ref[...], preferred_element_type=jnp.float32)
    acc = jnp.maximum(acc + b_ref[...], 0.0)         # bias + ReLU (fused)
    o_ref[...] = acc[None, None].astype(o_ref.dtype)  # (1, 1, TH*W, 4*Cout)


def _fold_weights_for_nearest2x(weight_oihw):
    """Fold the x2 nearest upsample into the 3x3 conv weights.

    Returns (9*Cin, 4*Cout) with rows ordered (ky, kx, ci) and cols ordered
    (py, px, co) such that
        out[y, x, py*2*Cout + px*Cout + co]
            == relu-less conv3x3(upsample2x(X))[2y+py, 2x+px, co]
    when `out` is the matmul of the 3x3 im2col of the 1-padded original image.
    """
    Cout, Cin, _, _ = weight_oihw.shape
    w = jnp.transpose(weight_oihw, (2, 3, 1, 0))        # (ky, kx, ci, co)
    # sel[p, a, k] = 1 if original tap k contributes to effective tap a of phase p
    sel = jnp.array([[[1., 0., 0.],
                      [0., 1., 1.]],
                     [[1., 1., 0.],
                      [0., 0., 1.]]], dtype=w.dtype)    # (2 phases, 2 taps, 3 taps)
    # Effective 2x2 kernel per phase: K[py, px, a, b, ci, co]
    K = jnp.einsum('yak,xbl,klio->yxabio', sel, sel, w)
    # Scatter each phase's 2x2 kernel into the 3x3 tap grid at offset (py, px):
    # phase (py, px) reads X_pad[y + py + a, x + px + b].
    wfold = jnp.zeros((2, 2, 3, 3, Cin, Cout), dtype=w.dtype)
    for py in range(2):
        for px in range(2):
            wfold = wfold.at[py, px, py:py + 2, px:px + 2].set(K[py, px])
    # (py, px, ky, kx, ci, co) -> (ky, kx, ci, py, px, co) -> (9*Cin, 4*Cout)
    return jnp.transpose(wfold, (2, 3, 4, 0, 1, 5)).reshape(9 * Cin, 4 * Cout)


def _pick_row_tile(H, W, cin, cout, itemsize, budget_bytes=16 * 2**20):
    """Largest divisor TH of H whose estimated per-tile VMEM footprint fits."""
    r8 = lambda n: -(-n // 8) * 8
    r128 = lambda n: -(-n // 128) * 128
    # Weights + bias stay resident across the whole grid (assume 2 buffers).
    fixed = 2 * r8(9 * cin) * r128(4 * cout) * itemsize + 2 * r128(4 * cout) * itemsize

    def est(th):
        m = th * W
        inp = 2 * (th + 2) * r8(W + 2) * r128(cin) * itemsize        # dbl-buffered in
        im2col_tmp = 9 * th * r8(W) * r128(cin) * itemsize           # concat temps
        pat = r8(m) * r128(9 * cin) * itemsize                        # im2col buffer
        outb = 2 * r8(m) * r128(4 * cout) * 4                         # dbl-buffered out
        return fixed + inp + im2col_tmp + pat + outb

    best = 1
    for th in range(1, H + 1):
        if H % th == 0 and est(th) <= budget_bytes:
            best = th
    return best


@functools.partial(jax.jit, static_argnames=("scale_factor",))
def resize_conv(x_nchw, weight_oihw, bias, scale_factor=2):
    """Pallas equivalent of ResizeConv.forward (NCHW in / NCHW out)."""
    if scale_factor != 2:
        # TODO(synk): general integer scale needs a different phase folding.
        raise NotImplementedError("resize_conv kernel supports scale_factor=2 only")

    B, Cin, H, W = x_nchw.shape
    Cout = weight_oihw.shape[0]
    H2, W2 = H * 2, W * 2

    # Only the SMALL original-resolution tensor is transposed/padded in HBM;
    # the upsampled intermediate is never materialized.
    x_nhwc = jnp.transpose(x_nchw, (0, 2, 3, 1))
    x_pad = jnp.pad(x_nhwc, ((0, 0), (1, 1), (1, 1), (0, 0)))   # (B, H+2, W+2, Cin)

    itemsize = jnp.dtype(x_nchw.dtype).itemsize
    TH = _pick_row_tile(H, W, Cin, Cout, itemsize)
    n_th = H // TH

    if n_th == 1:
        x_tiles = x_pad[:, None]                     # (B, 1, H+2, W+2, Cin) — free view
    else:
        # Overlapping row tiles with a 1-row halo on each side (small gather on
        # the small pre-upsample tensor only).
        rows = jnp.arange(n_th)[:, None] * TH + jnp.arange(TH + 2)[None, :]
        x_tiles = x_pad[:, rows]                     # (B, n_th, TH+2, W+2, Cin)

    w_mat = _fold_weights_for_nearest2x(weight_oihw)        # (9*Cin, 4*Cout)
    b_mat = jnp.tile(bias, 4).reshape(1, 4 * Cout)          # (py, px, co) order

    out = pl.pallas_call(
        _resize_conv2x_kernel,
        out_shape=jax.ShapeDtypeStruct((B, n_th, TH * W, 4 * Cout), x_nchw.dtype),
        grid_spec=pltpu.PrefetchScalarGridSpec(
            num_scalar_prefetch=0,
            grid=(B, n_th),
            in_specs=[
                pl.BlockSpec((1, 1, TH + 2, W + 2, Cin), lambda b, t: (b, t, 0, 0, 0)),
                pl.BlockSpec((9 * Cin, 4 * Cout), lambda b, t: (0, 0)),
                pl.BlockSpec((1, 4 * Cout), lambda b, t: (0, 0)),
            ],
            out_specs=pl.BlockSpec((1, 1, TH * W, 4 * Cout), lambda b, t: (b, t, 0, 0)),
        ),
        compiler_params=pltpu.CompilerParams(
            dimension_semantics=("parallel", "parallel")),   # megacore over (B, tiles)
    )(x_tiles, w_mat, b_mat)

    # Pixel-shuffle the 4 phases back to 2x spatial + NHWC->NCHW (one fused
    # XLA transpose of the output tensor).
    out = out.reshape(B, H, W, 2, 2, Cout)                     # (b, y, x, py, px, co)
    out = jnp.transpose(out, (0, 5, 1, 3, 2, 4)).reshape(B, Cout, H2, W2)
    return out


if __name__ == "__main__":
    B, Cin, Cout, H, W = 2, 4, 8, 16, 16
    scale = 2

    key = jax.random.PRNGKey(0)
    kx, kw, kb = jax.random.split(key, 3)

    x = jax.random.normal(kx, (B, Cin, H, W), dtype=jnp.float32)
    # deterministic init mimicking PyTorch Conv2d default (uniform +-1/sqrt(fan_in))
    fan_in = Cin * 3 * 3
    bound = 1.0 / (fan_in ** 0.5)
    weight = jax.random.uniform(kw, (Cout, Cin, 3, 3), jnp.float32,
                                minval=-bound, maxval=bound)
    bias = jax.random.uniform(kb, (Cout,), jnp.float32,
                              minval=-bound, maxval=bound)

    out = resize_conv(x, weight, bias, scale_factor=scale)
    out = jax.block_until_ready(out)
    assert out.shape == (B, Cout, H * scale, W * scale), out.shape

    # Pure-JAX reference (explicit nearest upsample + conv + relu)
    x_up = jnp.repeat(jnp.repeat(x, scale, axis=2), scale, axis=3)
    ref = jax.lax.conv_general_dilated(
        jnp.transpose(x_up, (0, 2, 3, 1)),
        jnp.transpose(weight, (2, 3, 1, 0)),
        window_strides=(1, 1), padding="SAME",
        dimension_numbers=("NHWC", "HWIO", "NHWC"))
    ref = jnp.maximum(ref + bias[None, None, None, :], 0.0)
    ref = jnp.transpose(ref, (0, 3, 1, 2))

    err = float(jnp.max(jnp.abs(out - ref)))
    assert jnp.allclose(out, ref, atol=1e-4, rtol=1e-4), err
    print("KERNEL_OK")
</pallas_src>

<mosaic_0001>
module attributes {stable_mosaic.version = 11 : i64} {
  func.func @_resize_conv2x_kernel(%arg0: i32, %arg1: i32, %arg2: memref<1x1x18x18x4xf32, #tpu.memory_space<vmem>>, %arg3: memref<36x32xf32, #tpu.memory_space<vmem>>, %arg4: memref<1x32xf32, #tpu.memory_space<vmem>>, %arg5: memref<1x1x256x32xf32, #tpu.memory_space<vmem>>) attributes {dimension_semantics = [#tpu.dimension_semantics<parallel>, #tpu.dimension_semantics<parallel>], iteration_bounds = array<i64: 2, 1>, scalar_prefetch = 0 : i64, scratch_operands = 0 : i64, tpu.core_type = #tpu.core_type<tc>, window_params = [{transform_indices = @transform_0, window_bounds = array<i64: 1, 1, 18, 18, 4>}, {pipeline_mode = #tpu.pipeline_mode<synchronous>, transform_indices = @transform_1, window_bounds = array<i64: 36, 32>}, {pipeline_mode = #tpu.pipeline_mode<synchronous>, transform_indices = @transform_2, window_bounds = array<i64: 1, 32>}, {transform_indices = @transform_3, window_bounds = array<i64: 1, 1, 256, 32>}]} {
    %c0 = arith.constant 0 : index
    %c0_0 = arith.constant 0 : index
    %c0_1 = arith.constant 0 : index
    %c0_2 = arith.constant 0 : index
    %c0_3 = arith.constant 0 : index
    %0 = vector.load %arg2[%c0, %c0_0, %c0_1, %c0_2, %c0_3] : memref<1x1x18x18x4xf32, #tpu.memory_space<vmem>>, vector<1x1x18x18x4xf32>
    %1 = vector.shape_cast %0 : vector<1x1x18x18x4xf32> to vector<18x18x4xf32>
    %2 = vector.extract_strided_slice %1 {offsets = [0, 0, 0], sizes = [16, 16, 4], strides = [1, 1, 1]} : vector<18x18x4xf32> to vector<16x16x4xf32>
    %3 = vector.extract_strided_slice %1 {offsets = [0, 1, 0], sizes = [16, 16, 4], strides = [1, 1, 1]} : vector<18x18x4xf32> to vector<16x16x4xf32>
    %4 = vector.extract_strided_slice %1 {offsets = [0, 2, 0], sizes = [16, 16, 4], strides = [1, 1, 1]} : vector<18x18x4xf32> to vector<16x16x4xf32>
    %5 = vector.extract_strided_slice %1 {offsets = [1, 0, 0], sizes = [16, 16, 4], strides = [1, 1, 1]} : vector<18x18x4xf32> to vector<16x16x4xf32>
    %6 = vector.extract_strided_slice %1 {offsets = [1, 1, 0], sizes = [16, 16, 4], strides = [1, 1, 1]} : vector<18x18x4xf32> to vector<16x16x4xf32>
    %7 = vector.extract_strided_slice %1 {offsets = [1, 2, 0], sizes = [16, 16, 4], strides = [1, 1, 1]} : vector<18x18x4xf32> to vector<16x16x4xf32>
    %8 = vector.extract_strided_slice %1 {offsets = [2, 0, 0], sizes = [16, 16, 4], strides = [1, 1, 1]} : vector<18x18x4xf32> to vector<16x16x4xf32>
    %9 = vector.extract_strided_slice %1 {offsets = [2, 1, 0], sizes = [16, 16, 4], strides = [1, 1, 1]} : vector<18x18x4xf32> to vector<16x16x4xf32>
    %10 = vector.extract_strided_slice %1 {offsets = [2, 2, 0], sizes = [16, 16, 4], strides = [1, 1, 1]} : vector<18x18x4xf32> to vector<16x16x4xf32>
    %11 = tpu.concatenate %2, %3, %4, %5, %6, %7, %8, %9, %10 in 2 : vector<16x16x4xf32>, vector<16x16x4xf32>, vector<16x16x4xf32>, vector<16x16x4xf32>, vector<16x16x4xf32>, vector<16x16x4xf32>, vector<16x16x4xf32>, vector<16x16x4xf32>, vector<16x16x4xf32> -> vector<16x16x36xf32>
    %12 = vector.shape_cast %11 : vector<16x16x36xf32> to vector<256x36xf32>
    %c0_4 = arith.constant 0 : index
    %c0_5 = arith.constant 0 : index
    %13 = vector.load %arg3[%c0_4, %c0_5] : memref<36x32xf32, #tpu.memory_space<vmem>>, vector<36x32xf32>
    %cst = arith.constant dense<0.000000e+00> : vector<256x32xf32>
    %14 = tpu.matmul %12, %13, %cst {dimension_numbers = #tpu.dot_dimension_numbers<[1], [0], [0], [1], [0, 0, 1, 1], [], []>} : vector<256x36xf32>, vector<36x32xf32>, vector<256x32xf32> -> vector<256x32xf32>
    %c0_6 = arith.constant 0 : index
    %c0_7 = arith.constant 0 : index
    %15 = vector.load %arg4[%c0_6, %c0_7] : memref<1x32xf32, #tpu.memory_space<vmem>>, vector<1x32xf32>
    %16 = vector.broadcast %15 : vector<1x32xf32> to vector<256x32xf32>
    %17 = arith.addf %14, %16 : vector<256x32xf32>
    %cst_8 = arith.constant 0.000000e+00 : f32
    %18 = vector.broadcast %cst_8 : f32 to vector<256x32xf32>
    %19 = arith.maximumf %17, %18 : vector<256x32xf32>
    %20 = vector.shape_cast %19 : vector<256x32xf32> to vector<1x1x256x32xf32>
    %c0_9 = arith.constant 0 : index
    %c0_10 = arith.constant 0 : index
    %c0_11 = arith.constant 0 : index
    %c0_12 = arith.constant 0 : index
    %21 = vector.load %arg5[%c0_9, %c0_10, %c0_11, %c0_12] : memref<1x1x256x32xf32, #tpu.memory_space<vmem>>, vector<1x1x256x32xf32>
    tpu.vector_store %arg5[%c0_9, %c0_10, %c0_11, %c0_12], %20 {strides = array<i32>} : memref<1x1x256x32xf32, #tpu.memory_space<vmem>>, vector<1x1x256x32xf32>,
    return
  }
  func.func @transform_0(%arg0: i32, %arg1: i32) -> (i32, i32, i32, i32, i32) {
    %c0_i32 = arith.constant 0 : i32
    %c0_i32_0 = arith.constant 0 : i32
    %c0_i32_1 = arith.constant 0 : i32
    %c0_i32_2 = arith.constant 0 : i32
    return %arg0, %arg1, %c0_i32, %c0_i32_0, %c0_i32_1 : i32, i32, i32, i32, i32
  }
  func.func @transform_1(%arg0: i32, %arg1: i32) -> (i32, i32) {
    %c0_i32 = arith.constant 0 : i32
    %c0_i32_0 = arith.constant 0 : i32
    %c0_i32_1 = arith.constant 0 : i32
    return %c0_i32, %c0_i32_0 : i32, i32
  }
  func.func @transform_2(%arg0: i32, %arg1: i32) -> (i32, i32) {
    %c0_i32 = arith.constant 0 : i32
    %c0_i32_0 = arith.constant 0 : i32
    %c0_i32_1 = arith.constant 0 : i32
    return %c0_i32, %c0_i32_0 : i32, i32
  }
  func.func @transform_3(%arg0: i32, %arg1: i32) -> (i32, i32, i32, i32) {
    %c0_i32 = arith.constant 0 : i32
    %c0_i32_0 = arith.constant 0 : i32
    %c0_i32_1 = arith.constant 0 : i32
    return %arg0, %arg1, %c0_i32, %c0_i32_0 : i32, i32, i32, i32
  }
}

</mosaic_0001>

<bundles_post_ra>
// kernel: tile.8
= control target key start
LH: loop header
LB: loop body
LE: loop exit
PB: predicated region body
PF: predicated region fallthrough
CT: control target
= control target key end

     0   :  { %s22_s0 = inlined_call_operand.vmem [shape: f32[8], index: 0, kind: input, shape index: {}]   ;;  %s23_s1 = inlined_call_operand.vmem [shape: f32[4,8], index: 1, kind: output, shape index: {}]  }
   0x1   :  { %v4_v0 = vld [vmem:[%s22_s0] ss:$0 sm:$0xff] }
   0x2   :  { %5 = vst [vmem:[%s23_s1] sm:$0xf] %v4_v0 }

// kernel: tile.9
= control target key start
LH: loop header
LB: loop body
LE: loop exit
PB: predicated region body
PF: predicated region fallthrough
CT: control target
= control target key end

     0   :  { %vm8_vm0 = vcmask 64512   ;;  %s40_s8 = smov 8   ;;  %s41_s9 = smov 16   ;;  %vm14_vm1 = vcmask 261312   ;;  %vm20_vm2 = vcmask 195712   ;;  %vm26_vm3 = vcmask 130112   ;;  %s58_s0 = inlined_call_operand.vmem [shape: f32[4,8], index: 0, kind: input, shape index: {}]   ;;  %s59_s1 = inlined_call_operand.vmem [shape: f32[1,32], index: 1, kind: output, shape index: {}]  }
   0x1   :  { %v5_v0 = vld [vmem:[%s58_s0] sm:$0xf]  ;;  %s39_s0 = smov 24  }
   0x2   :  { %6 = vst [vmem:[#allocation1] sm:$0xf] %v5_v0 }
   0x9   :  { %v11_v1 = vld [vmem:[#allocation1 + $0x3] sm:$0x1]   ;;  %v23_v2 = vld [vmem:[#allocation1 + $0x1] sm:$0x1]   ;;  %v7_v3 = vld [vmem:[#allocation1] sm:$0x1]  }
   0xa   :  { %12 = vrot.lane.b32.xlu0 %v11_v1, %s39_s0  ;;  %24 = vrot.lane.b32.xlu1 %v23_v2, %s40_s8  ;;  %v17_v4 = vld [vmem:[#allocation1 + $0x2] sm:$0x1]   ;;  %9 = vst.msk [vmem:[#allocation0] sm:$0x1] %vm8_vm0, %v7_v3  }
   0xe   :  { %18 = vrot.lane.b32.xlu0 %v17_v4, %s41_s9 }
  0x7c   :  { %v13_v5 = vpop.permute.xlu0 %12   ;;  %v25_v6 = vpop.permute.xlu1 %24  }
  0x7d   :  { %15 = vst.msk [vmem:[#allocation0] sm:$0x1] %vm14_vm1, %v13_v5  }
  0x80   :  { %v19_v7 = vpop.permute.xlu0 %18  }
  0x81   :  { %21 = vst.msk [vmem:[#allocation0] sm:$0x1] %vm20_vm2, %v19_v7  }
  0x82   :  { %27 = vst.msk [vmem:[#allocation0] sm:$0x1] %vm26_vm3, %v25_v6  }
  0x89   :  { %v32_v8 = vld [vmem:[#allocation0] sm:$0x1] }
  0x8a   :  { %35 = vst [vmem:[%s59_s1] sm:$0x1] %v32_v8 }

// kernel: resize_conv.1
= control target key start
LH: loop header
LB: loop body
LE: loop exit
PB: predicated region body
PF: predicated region fallthrough
CT: control target
= control target key end

     0   :  { %s2278_s12 = smov 0   ;;  %s2280_s13 = smov 0   ;;  %s4091_s0 = inlined_call_operand.vmem [shape: f32[2,1,18,18,4], index: 0, kind: input, shape index: {}]   ;;  %s4092_s1 = inlined_call_operand.vmem [shape: f32[36,32], index: 1, kind: input, shape index: {}]   ;;  %s4093_s2 = inlined_call_operand.vmem [shape: f32[1,32], index: 2, kind: input, shape index: {}]   ;;  %s4094_s3 = inlined_call_operand.vmem [shape: f32[2,1,256,32], index: 3, kind: output, shape index: {}]  }
   0x1   :  { %s2282_s14 = smov 0  }
   0x2 LB: > { %s25_s15 = sadd.s32 1, %s2244_s13  ;;  %p2027_p0 = scmp.ge.s32.totalorder %s2248_s14, 1  ;;  %s2248_s14 = sphi %s2282_s14, %s13_s14   ;;  %s2244_s13 = sphi %s2280_s13, %s4380_s13   ;;  %s2240_s12 = sphi %s2278_s12, %s4379_s12  }
   0x3   : > { %p27_p1 = scmp.ge.s32.totalorder %s25_s15, 2  ;;  %p157_p2 = scmp.lt.s32.totalorder %s2248_s14, 3 }
   0x5   : > { %s4382_s15 = smov (%p27_p1, %s25_s15), 0  ;;  %p158_p3 = pnand %p2027_p0, %p157_p2 }
   0x7   : > { %161 = sbr.rel (%p158_p3) target bundleno = 847 (0x34f), region = 32 }
   0xc   : > { %p189_p4 = scmp.lt.s32.totalorder %s2240_s12, 1  ;;  %vm309_vm0 = vcmask 1046528   ;;  %s2250_s20 = smov 4   ;;  %vm486_vm1 = vcmask 1045504   ;;  %vm1265_vm2 = vcmask 31744   ;;  %vm1298_vm3 = vcmask 64512  }
   0xd   : > { %s2251_s21 = smov 8   ;;  %s2252_s22 = smov 12   ;;  %vm1638_vm4 = vcmask 1043456   ;;  %vm1331_vm5 = vcmask 97280   ;;  %vm1364_vm6 = vcmask 130048   ;;  %vm1397_vm7 = vcmask 162816  }
   0xe   : > { %s4384_s12 = smov (!%p189_p4, %s2240_s12), 1  ;;  %s2253_s23 = smov 16   ;;  %vm1430_vm8 = vcmask 195584   ;;  %vm1463_vm9 = vcmask 228352   ;;  %vm1496_vm10 = vcmask 261120   ;;  %vm1541_vm11 = vcmask 293888  }
   0xf   : > { %s2173_s16 = smul.u32 432, %s4384_s12  ;;  %s2254_s24 = smov 20  }
  0x10   : > { %s2255_s25 = smov 24   ;;  %s2256_s30 = smov 28  }
  0x11   : > { %s2302_s19 = scalar_lea.vmem %s4091_s0, %s2173_s16  ;;  %s2257_s10 = smov 32  }
  0x12   : > { %v2305_v0 = vld [vmem:[%s2302_s19 + $0x18] sm:$0xff]  ;;  %v2308_v1 = vld [vmem:[%s2302_s19 + $0x20] sm:$0xff]  ;;  %v2316_v5 = vld [vmem:[%s2302_s19 + $0x8] sm:$0xff]  ;;  %s2067_s17 = sshll.u32 %s4384_s12, 8 }
  0x13   : > { %v2311_v2 = vld [vmem:[%s2302_s19] sm:$0xff]  ;;  %v315_v3 = vrot.slane %v2305_v0, 1  ;;  %v316_v4 = vrot.slane %v2308_v1, 1  ;;  %v2320_v7 = vld [vmem:[%s2302_s19 + $0x28] sm:$0x3]  ;;  %v311_v8 = vrot.slane %v2316_v5, 1 }
  0x14   : > { %v310_v6 = vrot.slane %v2311_v2, 1  ;;  %v318_v9 = vrot.slane %v2320_v7, 1  ;;  %v2325_v10 = vld [vmem:[%s2302_s19 + $0x10] sm:$0x3]  ;;  %v2328_v11 = vld [vmem:[%s2302_s19 + $0x38] sm:$0xff]  ;;  %v2358_v24 = vld [vmem:[%s2302_s19 + $0x48] sm:$0xff] }
  0x15   : > { %v2331_v12 = vsel %vm309_vm0, %v315_v3, %v316_v4  ;;  %v313_v13 = vrot.slane %v2325_v10, 1  ;;  %v2335_v14 = vld [vmem:[%s2302_s19 + $0x40] sm:$0x3]  ;;  %v2338_v15 = vld [vmem:[%s2302_s19 + $0x30] sm:$0xff]  ;;  %v321_v18 = vrot.slane %v2328_v11, 1  ;;  %v325_v29 = vrot.slane %v2358_v24, 1 }
  0x16   : > { %394 = vrot.lane.b32.xlu1 %v2331_v12, %s2250_s20  ;;  %v312_v16 = vsel %vm309_vm0, %v310_v6, %v311_v8  ;;  %v2345_v17 = vsel %vm309_vm0, %v316_v4, %v318_v9  ;;  %v323_v19 = vrot.slane %v2335_v14, 1  ;;  %v320_v21 = vrot.slane %v2338_v15, 1  ;;  %v2352_v22 = vld [vmem:[%s2302_s19 + $0x50] sm:$0xff]  ;;  %v2355_v23 = vld [vmem:[%s2302_s19 + $0x58] sm:$0x3]  ;;  %v2373_v30 = vld [vmem:[%s2302_s19 + $0x68] sm:$0xff] }
  0x17   : > { %390 = vrot.lane.b32.xlu0 %v312_v16, %s2250_s20  ;;  %v314_v20 = vsel %vm309_vm0, %v311_v8, %v313_v13  ;;  %v326_v26 = vrot.slane %v2352_v22, 1  ;;  %v328_v27 = vrot.slane %v2355_v23, 1  ;;  %v2376_v31 = vld [vmem:[%s2302_s19 + $0x70] sm:$0x3]  ;;  %v2379_v32 = vld [vmem:[%s2302_s19 + $0x60] sm:$0xff]  ;;  %v331_v34 = vrot.slane %v2373_v30, 1 }
  0x18   : > { %v2364_v25 = vsel %vm309_vm0, %v321_v18, %v323_v19  ;;  %v2369_v28 = vsel %vm309_vm0, %v320_v21, %v321_v18  ;;  %v333_v35 = vrot.slane %v2376_v31, 1  ;;  %v330_v37 = vrot.slane %v2379_v32, 1  ;;  %v2395_v38 = vld [vmem:[%s2302_s19 + $0x80] sm:$0xff]  ;;  %v2398_v39 = vld [vmem:[%s2302_s19 + $0x88] sm:$0x3]  ;;  %v2401_v40 = vld [vmem:[%s2302_s19 + $0x78] sm:$0xff] }
  0x19   : > { %v2386_v33 = vsel %vm309_vm0, %v326_v26, %v328_v27  ;;  %v2391_v36 = vsel %vm309_vm0, %v325_v29, %v326_v26  ;;  %v336_v42 = vrot.slane %v2395_v38, 1  ;;  %v338_v43 = vrot.slane %v2398_v39, 1  ;;  %v2417_v46 = vld [vmem:[%s2302_s19 + $0x98] sm:$0xff]  ;;  %v2420_v47 = vld [vmem:[%s2302_s19 + $0xa0] sm:$0x3]  ;;  %v2423_v48 = vld [vmem:[%s2302_s19 + $0x90] sm:$0xff] }
  0x1a   : > { %396 = vrot.lane.b32.xlu1 %v2345_v17, %s2250_s20  ;;  %4202 = vst [vmem:[#allocation2_spill] sm:$0xff] %v2391_v36  ;;  %v2408_v41 = vsel %vm309_vm0, %v331_v34, %v333_v35  ;;  %v2413_v44 = vsel %vm309_vm0, %v330_v37, %v331_v34  ;;  %v335_v45 = vrot.slane %v2401_v40, 1  ;;  %v341_v50 = vrot.slane %v2417_v46, 1  ;;  %v2439_v54 = vld [vmem:[%s2302_s19 + $0xb0] sm:$0xff]  ;;  %v2442_v55 = vld [vmem:[%s2302_s19 + $0xb8] sm:$0x3] }
  0x1b   : > { %392 = vrot.lane.b32.xlu0 %v314_v20, %s2250_s20  ;;  %4203 = vst [vmem:[#allocation3_spill] sm:$0xff] %v2408_v41  ;;  %4204 = vst [vmem:[#allocation4_spill] sm:$0xff] %v2413_v44  ;;  %v2430_v49 = vsel %vm309_vm0, %v336_v42, %v338_v43  ;;  %v343_v51 = vrot.slane %v2420_v47, 1  ;;  %v340_v53 = vrot.slane %v2423_v48, 1  ;;  %v2445_v56 = vld [vmem:[%s2302_s19 + $0xa8] sm:$0xff]  ;;  %v346_v58 = vrot.slane %v2439_v54, 1 }
  0x1c   : > { %4205 = vst [vmem:[#allocation5_spill] sm:$0xff] %v2430_v49  ;;  %v2435_v52 = vsel %vm309_vm0, %v335_v45, %v336_v42  ;;  %v348_v59 = vrot.slane %v2442_v55, 1  ;;  %v345_v61 = vrot.slane %v2445_v56, 1  ;;  %v2461_v62 = vld [vmem:[%s2302_s19 + $0xc8] sm:$0xff]  ;;  %v2464_v63 = vld [vmem:[%s2302_s19 + $0xd0] sm:$0x3] }
  0x1d   : > { %4206 = vst [vmem:[#allocation6_spill] sm:$0xff] %v2435_v52  ;;  %v2452_v57 = vsel %vm309_vm0, %v341_v50, %v343_v51  ;;  %v2457_v60 = vsel %vm309_vm0, %v340_v53, %v341_v50  ;;  %v2467_v3 = vld [vmem:[%s2302_s19 + $0xc0] sm:$0xff]  ;;  %v351_v6 = vrot.slane %v2461_v62, 1  ;;  %v353_v8 = vrot.slane %v2464_v63, 1  ;;  %v2486_v18 = vld [vmem:[%s2302_s19 + $0xe8] sm:$0x3] }
  0x1e   : > { %400 = vrot.lane.b32.xlu1 %v2364_v25, %s2250_s20  ;;  %4207 = vst [vmem:[#allocation7_spill] sm:$0xff] %v2452_v57  ;;  %4208 = vst [vmem:[#allocation8_spill] sm:$0xff] %v2457_v60  ;;  %v2474_v4 = vsel %vm309_vm0, %v346_v58, %v348_v59  ;;  %v2479_v9 = vsel %vm309_vm0, %v345_v61, %v346_v58  ;;  %v350_v13 = vrot.slane %v2467_v3, 1  ;;  %v2483_v16 = vld [vmem:[%s2302_s19 + $0xe0] sm:$0xff]  ;;  %v2489_v19 = vld [vmem:[%s2302_s19 + $0xd8] sm:$0xff]  ;;  %v358_v26 = vrot.slane %v2486_v18, 1 }
  0x1f   : > { %398 = vrot.lane.b32.xlu0 %v2369_v28, %s2250_s20  ;;  %4209 = vst [vmem:[#allocation9_spill] sm:$0xff] %v2474_v4  ;;  %4210 = vst [vmem:[#allocation10_spill] sm:$0xff] %v2479_v9  ;;  %v2496_v20 = vsel %vm309_vm0, %v351_v6, %v353_v8  ;;  %v356_v21 = vrot.slane %v2483_v16, 1  ;;  %v355_v29 = vrot.slane %v2489_v19, 1  ;;  %v2505_v34 = vld [vmem:[%s2302_s19 + $0xf8] sm:$0xff]  ;;  %v2511_v37 = vld [vmem:[%s2302_s19 + $0xf0] sm:$0xff] }
  0x20   : > { %4211 = vst [vmem:[#allocation11_spill] sm:$0xff] %v2496_v20  ;;  %v2501_v27 = vsel %vm309_vm0, %v350_v13, %v351_v6  ;;  %v2508_v35 = vld [vmem:[%s2302_s19 + $0x100] sm:$0x3]  ;;  %v361_v43 = vrot.slane %v2505_v34, 1  ;;  %v360_v51 = vrot.slane %v2511_v37, 1  ;;  %v2527_v53 = vld [vmem:[%s2302_s19 + $0x110] sm:$0xff] }
  0x21   : > { %4212 = vst [vmem:[#allocation12_spill] sm:$0xff] %v2501_v27  ;;  %v2518_v42 = vsel %vm309_vm0, %v356_v21, %v358_v26  ;;  %v363_v45 = vrot.slane %v2508_v35, 1  ;;  %v2523_v50 = vsel %vm309_vm0, %v355_v29, %v356_v21  ;;  %v2530_v58 = vld [vmem:[%s2302_s19 + $0x118] sm:$0x3]  ;;  %v2533_v59 = vld [vmem:[%s2302_s19 + $0x108] sm:$0xff]  ;;  %v366_v6 = vrot.slane %v2527_v53, 1 }
  0x22   : > { %404 = vrot.lane.b32.xlu1 %v2386_v33, %s2250_s20  ;;  %4213 = vst [vmem:[#allocation13_spill] sm:$0xff] %v2518_v42  ;;  %4214 = vst [vmem:[#allocation14_spill] sm:$0xff] %v2523_v50  ;;  %v368_v8 = vrot.slane %v2530_v58, 1  ;;  %v2545_v13 = vsel %vm309_vm0, %v360_v51, %v361_v43  ;;  %v365_v21 = vrot.slane %v2533_v59, 1  ;;  %v2549_v26 = vld [vmem:[%s2302_s19 + $0x128] sm:$0xff] }
  0x23   : > { %402 = vrot.lane.b32.xlu0 %v2391_v36, %s2250_s20  ;;  %v2540_v61 = vsel %vm309_vm0, %v361_v43, %v363_v45  ;;  %4216 = vst [vmem:[#allocation16_spill] sm:$0xff] %v2545_v13  ;;  %v2552_v29 = vld [vmem:[%s2302_s19 + $0x130] sm:$0x3]  ;;  %v371_v43 = vrot.slane %v2549_v26, 1 }
  0x24   : > { %4215 = vst [vmem:[#allocation15_spill] sm:$0xff] %v2540_v61  ;;  %v2562_v45 = vsel %vm309_vm0, %v366_v6, %v368_v8  ;;  %v373_v51 = vrot.slane %v2552_v29, 1 }
  0x25   : > { %4217 = vst [vmem:[#allocation17_spill] sm:$0xff] %v2562_v45 }
  0x26   : > { %408 = vrot.lane.b32.xlu1 %v2408_v41, %s2250_s20  ;;  %v2584_v8 = vsel %vm309_vm0, %v371_v43, %v373_v51 }
  0x27   : > { %406 = vrot.lane.b32.xlu0 %v2413_v44, %s2250_s20  ;;  %4219 = vst [vmem:[#allocation19_spill] sm:$0xff] %v2584_v8  ;;  %v2618_v44 = vld [vmem:[%s2302_s19 + $0x178] sm:$0x3] }
  0x2a   : > { %412 = vrot.lane.b32.xlu1 %v2430_v49, %s2250_s20  ;;  %v2615_v49 = vld [vmem:[%s2302_s19 + $0x170] sm:$0xff] }
  0x2b   : > { %410 = vrot.lane.b32.xlu0 %v2435_v52, %s2250_s20 }
  0x2e   : > { %416 = vrot.lane.b32.xlu1 %v2452_v57, %s2250_s20 }
  0x2f   : > { %414 = vrot.lane.b32.xlu0 %v2457_v60, %s2250_s20  ;;  %v2593_v60 = vld [vmem:[%s2302_s19 + $0x158] sm:$0xff] }
  0x32   : > { %420 = vrot.lane.b32.xlu1 %v2474_v4, %s2250_s20 }
  0x33   : > { %418 = vrot.lane.b32.xlu0 %v2479_v9, %s2250_s20 }
  0x36   : > { %424 = vrot.lane.b32.xlu1 %v2496_v20, %s2250_s20  ;;  %v2555_v20 = vld [vmem:[%s2302_s19 + $0x120] sm:$0xff] }
  0x37   : > { %422 = vrot.lane.b32.xlu0 %v2501_v27, %s2250_s20  ;;  %v370_v27 = vrot.slane %v2555_v20, 1 }
  0x39   : > { %v2589_v9 = vsel %vm309_vm0, %v370_v27, %v371_v43  ;;  %v381_v27 = vrot.slane %v2593_v60, 1 }
  0x3a   : > { %428 = vrot.lane.b32.xlu1 %v2518_v42, %s2250_s20  ;;  %v2567_v42 = vsel %vm309_vm0, %v365_v21, %v366_v6  ;;  %4220 = vst [vmem:[#allocation20_spill] sm:$0xff] %v2589_v9 }
  0x3b   : > { %426 = vrot.lane.b32.xlu0 %v2523_v50, %s2250_s20  ;;  %4218 = vst [vmem:[#allocation18_spill] sm:$0xff] %v2567_v42  ;;  %v2571_v50 = vld [vmem:[%s2302_s19 + $0x140] sm:$0xff] }
  0x3c   : > { %v376_v6 = vrot.slane %v2571_v50, 1 }
  0x3e   : > { %432 = vrot.lane.b32.xlu1 %v2540_v61, %s2250_s20  ;;  %v2574_v61 = vld [vmem:[%s2302_s19 + $0x148] sm:$0x3] }
  0x3f   : > { %430 = vrot.lane.b32.xlu0 %v2545_v13, %s2250_s20  ;;  %v2577_v13 = vld [vmem:[%s2302_s19 + $0x138] sm:$0xff]  ;;  %v378_v21 = vrot.slane %v2574_v61, 1 }
  0x40   : > { %v375_v4 = vrot.slane %v2577_v13, 1 }
  0x41   : > { %v2606_v51 = vsel %vm309_vm0, %v376_v6, %v378_v21 }
  0x42   : > { %436 = vrot.lane.b32.xlu1 %v2562_v45, %s2250_s20  ;;  %v2596_v45 = vld [vmem:[%s2302_s19 + $0x160] sm:$0x3]  ;;  %4221 = vst [vmem:[#allocation21_spill] sm:$0xff] %v2606_v51  ;;  %v2611_v57 = vsel %vm309_vm0, %v375_v4, %v376_v6  ;;  %v386_v4 = vrot.slane %v2615_v49, 1  ;;  %v388_v6 = vrot.slane %v2618_v44, 1 }
  0x43   : > { %434 = vrot.lane.b32.xlu0 %v2567_v42, %s2250_s20  ;;  %v2599_v42 = vld [vmem:[%s2302_s19 + $0x150] sm:$0xff]  ;;  %v383_v43 = vrot.slane %v2596_v45, 1  ;;  %4222 = vst [vmem:[#allocation22_spill] sm:$0xff] %v2611_v57 }
  0x44   : > { %v380_v52 = vrot.slane %v2599_v42, 1 }
  0x45   : > { %v2628_v21 = vsel %vm309_vm0, %v381_v27, %v383_v43  ;;  %v488_v43 = vrot.slane %v2316_v5, 2  ;;  %v495_v5 = vrot.slane %v2320_v7, 2  ;;  %v497_v7 = vrot.slane %v2338_v15, 2 }
  0x46   : > { %440 = vrot.lane.b32.xlu1 %v2584_v8, %s2250_s20  ;;  %v2621_v8 = vld [vmem:[%s2302_s19 + $0x168] sm:$0xff]  ;;  %4224 = vst [vmem:[#allocation24_spill] sm:$0xff] %v2628_v21 }
  0x47   : > { %438 = vrot.lane.b32.xlu0 %v2589_v9, %s2250_s20  ;;  %4223 = vst [vmem:[#allocation23_spill] sm:$0xff] %v2621_v8  ;;  %v2633_v9 = vsel %vm309_vm0, %v380_v52, %v381_v27  ;;  %v385_v41 = vrot.slane %v2621_v8, 1  ;;  %v487_v52 = vrot.slane %v2311_v2, 2 }
  0x48   : > { %4225 = vst [vmem:[#allocation25_spill] sm:$0xff] %v2633_v9 }
  0x49   : > { %v2646_v36 = vsel %vm309_vm0, %v385_v41, %v386_v4  ;;  %v492_v41 = vrot.slane %v2305_v0, 2 }
  0x4a   : > { %444 = vrot.lane.b32.xlu1 %v2606_v51, %s2250_s20  ;;  %v2641_v51 = vsel %vm309_vm0, %v386_v4, %v388_v6  ;;  %4227 = vst [vmem:[#allocation27_spill] sm:$0xff] %v2646_v36  ;;  %v493_v6 = vrot.slane %v2308_v1, 2  ;;  %v498_v4 = vrot.slane %v2328_v11, 2 }
  0x4b   : > { %442 = vrot.lane.b32.xlu0 %v2611_v57, %s2250_s20  ;;  %4226 = vst [vmem:[#allocation26_spill] sm:$0xff] %v2641_v51  ;;  %v490_v57 = vrot.slane %v2325_v10, 2  ;;  %v489_v10 = vsel %vm486_vm1, %v487_v52, %v488_v43  ;;  %v503_v52 = vrot.slane %v2352_v22, 2 }
  0x4c   : > { %v2661_v2 = vsel %vm486_vm1, %v493_v6, %v495_v5 }
  0x4d   : > { %v491_v27 = vsel %vm486_vm1, %v488_v43, %v490_v57  ;;  %v500_v57 = vrot.slane %v2335_v14, 2  ;;  %v2679_v14 = vsel %vm486_vm1, %v497_v7, %v498_v4  ;;  %v513_v7 = vrot.slane %v2395_v38, 2 }
  0x4e   : > { %448 = vrot.lane.b32.xlu1 %v2628_v21, %s2250_s20  ;;  %4229 = vst [vmem:[#allocation29_spill] sm:$0xff] %v2679_v14  ;;  %v525_v21 = vrot.slane %v2442_v55, 2 }
  0x4f   : > { %446 = vrot.lane.b32.xlu0 %v2633_v9, %s2250_s20  ;;  %v2674_v43 = vsel %vm486_vm1, %v498_v4, %v500_v57  ;;  %v507_v4 = vrot.slane %v2379_v32, 2  ;;  %v530_v9 = vrot.slane %v2464_v63, 2 }
  0x50   : > { %4228 = vst [vmem:[#allocation28_spill] sm:$0xff] %v2674_v43 }
  0x52   : > { %452 = vrot.lane.b32.xlu1 %v2641_v51, %s2250_s20  ;;  %v2666_v51 = vsel %vm486_vm1, %v492_v41, %v493_v6  ;;  %v502_v6 = vrot.slane %v2358_v24, 2  ;;  %v510_v41 = vrot.slane %v2376_v31, 2 }
  0x53   : > { %450 = vrot.lane.b32.xlu0 %v2646_v36, %s2250_s20  ;;  %v520_v36 = vrot.slane %v2420_v47, 2  ;;  %s3921_s20 = scalar_lea.vmem %s4094_s3, %s2067_s17 }
  0x56   : > { %569 = vrot.lane.b32.xlu1 %v491_v27, %s2251_s21  ;;  %v505_v27 = vrot.slane %v2355_v23, 2  ;;  %v2692_v23 = vsel %vm486_vm1, %v502_v6, %v503_v52 }
  0x57   : > { %567 = vrot.lane.b32.xlu0 %v489_v10, %s2251_s21  ;;  %v508_v10 = vrot.slane %v2373_v30, 2  ;;  %4231 = vst [vmem:[#allocation31_spill] sm:$0xff] %v2692_v23 }
  0x58   : > { %v2687_v5 = vsel %vm486_vm1, %v503_v52, %v505_v27  ;;  %v515_v27 = vrot.slane %v2398_v39, 2  ;;  %v512_v52 = vrot.slane %v2401_v40, 2 }
  0x59   : > { %4230 = vst [vmem:[#allocation30_spill] sm:$0xff] %v2687_v5  ;;  %v2700_v57 = vsel %vm486_vm1, %v508_v10, %v510_v41  ;;  %v2705_v31 = vsel %vm486_vm1, %v507_v4, %v508_v10  ;;  %v518_v41 = vrot.slane %v2417_v46, 2  ;;  %v517_v10 = vrot.slane %v2423_v48, 2 }
  0x5a   : > { %573 = vrot.lane.b32.xlu1 %v2661_v2, %s2251_s21  ;;  %4232 = vst [vmem:[#allocation32_spill] sm:$0xff] %v2700_v57  ;;  %4233 = vst [vmem:[#allocation33_spill] sm:$0xff] %v2705_v31  ;;  %v2713_v6 = vsel %vm486_vm1, %v513_v7, %v515_v27  ;;  %v2718_v39 = vsel %vm486_vm1, %v512_v52, %v513_v7  ;;  %v523_v27 = vrot.slane %v2439_v54, 2  ;;  %v522_v7 = vrot.slane %v2445_v56, 2 }
  0x5b   : > { %571 = vrot.lane.b32.xlu0 %v2666_v51, %s2251_s21  ;;  %4234 = vst [vmem:[#allocation34_spill] sm:$0xff] %v2713_v6  ;;  %4235 = vst [vmem:[#allocation35_spill] sm:$0xff] %v2718_v39  ;;  %v2726_v4 = vsel %vm486_vm1, %v518_v41, %v520_v36  ;;  %v2731_v47 = vsel %vm486_vm1, %v517_v10, %v518_v41  ;;  %v528_v36 = vrot.slane %v2461_v62, 2  ;;  %v527_v41 = vrot.slane %v2467_v3, 2 }
  0x5c   : > { %4236 = vst [vmem:[#allocation36_spill] sm:$0xff] %v2726_v4  ;;  %4237 = vst [vmem:[#allocation37_spill] sm:$0xff] %v2731_v47  ;;  %v2739_v52 = vsel %vm486_vm1, %v523_v27, %v525_v21  ;;  %v2744_v55 = vsel %vm486_vm1, %v522_v7, %v523_v27  ;;  %v533_v21 = vrot.slane %v2483_v16, 2  ;;  %v532_v27 = vrot.slane %v2489_v19, 2 }
  0x5d   : > { %4238 = vst [vmem:[#allocation38_spill] sm:$0xff] %v2739_v52  ;;  %4239 = vst [vmem:[#allocation39_spill] sm:$0xff] %v2744_v55  ;;  %v2752_v10 = vsel %vm486_vm1, %v528_v36, %v530_v9  ;;  %v2757_v63 = vsel %vm486_vm1, %v527_v41, %v528_v36  ;;  %v538_v9 = vrot.slane %v2505_v34, 2  ;;  %v537_v36 = vrot.slane %v2511_v37, 2 }
  0x5e   : > { %577 = vrot.lane.b32.xlu1 %v2674_v43, %s2251_s21  ;;  %4240 = vst [vmem:[#allocation40_spill] sm:$0xff] %v2752_v10  ;;  %4241 = vst [vmem:[#allocation41_spill] sm:$0xff] %v2757_v63 }
  0x5f   : > { %575 = vrot.lane.b32.xlu0 %v2679_v14, %s2251_s21  ;;  %v2991_v14 = vld [vmem:[%s2302_s19 + $0x180] sm:$0xff] }
  0x60   : > { %4268 = vst [vmem:[#allocation68_spill] sm:$0xff] %v2991_v14 }
  0x62   : > { %581 = vrot.lane.b32.xlu1 %v2687_v5, %s2251_s21 }
  0x63   : > { %579 = vrot.lane.b32.xlu0 %v2692_v23, %s2251_s21 }
  0x66   : > { %585 = vrot.lane.b32.xlu1 %v2700_v57, %s2251_s21 }
  0x67   : > { %583 = vrot.lane.b32.xlu0 %v2705_v31, %s2251_s21 }
  0x6a   : > { %589 = vrot.lane.b32.xlu1 %v2713_v6, %s2251_s21 }
  0x6b   : > { %587 = vrot.lane.b32.xlu0 %v2718_v39, %s2251_s21 }
  0x6e   : > { %593 = vrot.lane.b32.xlu1 %v2726_v4, %s2251_s21  ;;  %v535_v4 = vrot.slane %v2486_v18, 2  ;;  %v2770_v18 = vsel %vm486_vm1, %v532_v27, %v533_v21 }
  0x6f   : > { %591 = vrot.lane.b32.xlu0 %v2731_v47, %s2251_s21  ;;  %v560_v47 = vrot.slane %v2596_v45, 2  ;;  %v563_v45 = vrot.slane %v2615_v49, 2 }
  0x70   : > { %v2765_v7 = vsel %vm486_vm1, %v533_v21, %v535_v4  ;;  %v543_v4 = vrot.slane %v2527_v53, 2  ;;  %v542_v21 = vrot.slane %v2533_v59, 2 }
  0x72   : > { %597 = vrot.lane.b32.xlu1 %v2739_v52, %s2251_s21  ;;  %v540_v52 = vrot.slane %v2508_v35, 2  ;;  %v2783_v35 = vsel %vm486_vm1, %v537_v36, %v538_v9 }
  0x73   : > { %595 = vrot.lane.b32.xlu0 %v2744_v55, %s2251_s21  ;;  %4243 = vst [vmem:[#allocation43_spill] sm:$0xff] %v2783_v35  ;;  %v555_v55 = vrot.slane %v2574_v61, 2 }
  0x74   : > { %v2778_v41 = vsel %vm486_vm1, %v538_v9, %v540_v52  ;;  %v548_v52 = vrot.slane %v2549_v26, 2  ;;  %v547_v9 = vrot.slane %v2555_v20, 2 }
  0x75   : > { %4242 = vst [vmem:[#allocation42_spill] sm:$0xff] %v2778_v41 }
  0x76   : > { %601 = vrot.lane.b32.xlu1 %v2752_v10, %s2251_s21  ;;  %v545_v10 = vrot.slane %v2530_v58, 2  ;;  %v2796_v58 = vsel %vm486_vm1, %v542_v21, %v543_v4 }
  0x77   : > { %599 = vrot.lane.b32.xlu0 %v2757_v63, %s2251_s21  ;;  %v550_v63 = vrot.slane %v2552_v29, 2  ;;  %4245 = vst [vmem:[#allocation45_spill] sm:$0xff] %v2796_v58  ;;  %v2809_v29 = vsel %vm486_vm1, %v547_v9, %v548_v52 }
  0x78   : > { %v2791_v27 = vsel %vm486_vm1, %v543_v4, %v545_v10  ;;  %v553_v10 = vrot.slane %v2571_v50, 2  ;;  %4247 = vst [vmem:[#allocation47_spill] sm:$0xff] %v2809_v29  ;;  %v552_v4 = vrot.slane %v2577_v13, 2 }
  0x79   : > { %4244 = vst [vmem:[#allocation44_spill] sm:$0xff] %v2791_v27  ;;  %v2804_v36 = vsel %vm486_vm1, %v548_v52, %v550_v63  ;;  %v558_v63 = vrot.slane %v2593_v60, 2  ;;  %v557_v52 = vrot.slane %v2599_v42, 2 }
  0x7a   : > { %605 = vrot.lane.b32.xlu1 %v2765_v7, %s2251_s21  ;;  %4246 = vst [vmem:[#allocation46_spill] sm:$0xff] %v2804_v36  ;;  %v2817_v21 = vsel %vm486_vm1, %v553_v10, %v555_v55  ;;  %v2824_v61 = vsel %vm486_vm1, %v552_v4, %v553_v10  ;;  %v562_v4 = vrot.slane %v2621_v8, 2 }
  0x7b   : > { %603 = vrot.lane.b32.xlu0 %v2770_v18, %s2251_s21  ;;  %4248 = vst [vmem:[#allocation48_spill] sm:$0xff] %v2817_v21  ;;  %4250 = vst [vmem:[#allocation50_spill] sm:$0xff] %v2824_v61  ;;  %v2834_v55 = vsel %vm486_vm1, %v558_v63, %v560_v47  ;;  %v2841_v10 = vsel %vm486_vm1, %v557_v52, %v558_v63 }
  0x7c   : > { %4252 = vst [vmem:[#allocation52_spill] sm:$0xff] %v2834_v55  ;;  %4254 = vst [vmem:[#allocation54_spill] sm:$0xff] %v2841_v10 }
  0x7e   : > { %609 = vrot.lane.b32.xlu1 %v2778_v41, %s2251_s21 }
  0x7f   : > { %607 = vrot.lane.b32.xlu0 %v2783_v35, %s2251_s21 }
  0x82   : > { %613 = vrot.lane.b32.xlu1 %v2791_v27, %s2251_s21 }
  0x83   : > { %611 = vrot.lane.b32.xlu0 %v2796_v58, %s2251_s21 }
  0x86   : > { %617 = vrot.lane.b32.xlu1 %v2804_v36, %s2251_s21 }
  0x87   : > { %615 = vrot.lane.b32.xlu0 %v2809_v29, %s2251_s21 }
  0x88   : > { %v2821_v6 = vpop.permute.xlu1 %394 }
  0x89   : > { %4249 = vst [vmem:[#allocation49_spill] sm:$0xff] %v2821_v6  ;;  %v2827_v9 = vpop.permute.xlu0 %390  ;;  %v565_v6 = vrot.slane %v2618_v44, 2  ;;  %v2856_v44 = vsel %vm486_vm1, %v562_v4, %v563_v45 }
  0x8a   : > { %4251 = vst [vmem:[#allocation51_spill] sm:$0xff] %v2827_v9  ;;  %621 = vrot.lane.b32.xlu1 %v2817_v21, %s2251_s21  ;;  %4257 = vst [vmem:[#allocation57_spill] sm:$0xff] %v2856_v44 }
  0x8b   : > { %619 = vrot.lane.b32.xlu0 %v2824_v61, %s2251_s21  ;;  %v2851_v47 = vsel %vm486_vm1, %v563_v45, %v565_v6 }
  0x8c   : > { %v2838_v39 = vpop.permute.xlu1 %396  ;;  %4256 = vst [vmem:[#allocation56_spill] sm:$0xff] %v2851_v47 }
  0x8d   : > { %4253 = vst [vmem:[#allocation53_spill] sm:$0xff] %v2838_v39  ;;  %v2844_v9 = vpop.permute.xlu0 %392 }
  0x8e   : > { %4255 = vst [vmem:[#allocation55_spill] sm:$0xff] %v2844_v9  ;;  %625 = vrot.lane.b32.xlu1 %v2834_v55, %s2251_s21 }
  0x8f   : > { %623 = vrot.lane.b32.xlu0 %v2841_v10, %s2251_s21 }
  0x90   : > { %v2853_v21 = vpop.permute.xlu1 %400 }
  0x91   : > { %v2858_v63 = vpop.permute.xlu0 %398 }
  0x92   : > { %629 = vrot.lane.b32.xlu1 %v2851_v47, %s2251_s21 }
  0x93   : > { %627 = vrot.lane.b32.xlu0 %v2856_v44, %s2251_s21 }
  0x94   : > { %v2864_v52 = vpop.permute.xlu1 %404 }
  0x95   : > { %v2866_v55 = vpop.permute.xlu0 %402 }
  0x96   : > { %667 = vrot.lane.b32.xlu1 %v2308_v1, %s2252_s22 }
  0x97   : > { %665 = vrot.lane.b32.xlu0 %v2305_v0, %s2252_s22 }
  0x98   : > { %v2872_v6 = vpop.permute.xlu1 %408 }
  0x99   : > { %v2874_v45 = vpop.permute.xlu0 %406 }
  0x9a   : > { %671 = vrot.lane.b32.xlu1 %v2328_v11, %s2252_s22 }
  0x9b   : > { %669 = vrot.lane.b32.xlu0 %v2338_v15, %s2252_s22 }
  0x9c   : > { %v2880_v4 = vpop.permute.xlu1 %412 }
  0x9d   : > { %v2882_v47 = vpop.permute.xlu0 %410 }
  0x9e   : > { %675 = vrot.lane.b32.xlu1 %v2352_v22, %s2252_s22 }
  0x9f   : > { %673 = vrot.lane.b32.xlu0 %v2358_v24, %s2252_s22 }
  0xa0   : > { %v2888_v0 = vpop.permute.xlu1 %416 }
  0xa1   : > { %v2890_v1 = vpop.permute.xlu0 %414 }
  0xa2   : > { %679 = vrot.lane.b32.xlu1 %v2373_v30, %s2252_s22 }
  0xa3   : > { %677 = vrot.lane.b32.xlu0 %v2379_v32, %s2252_s22 }
  0xa4   : > { %v2896_v44 = vpop.permute.xlu1 %420 }
  0xa5   : > { %v2898_v39 = vpop.permute.xlu0 %418 }
  0xa6   : > { %683 = vrot.lane.b32.xlu1 %v2395_v38, %s2252_s22 }
  0xa7   : > { %681 = vrot.lane.b32.xlu0 %v2401_v40, %s2252_s22 }
  0xa8   : > { %v2904_v10 = vpop.permute.xlu1 %424 }
  0xa9   : > { %4258 = vst [vmem:[#allocation58_spill] sm:$0xff] %v2904_v10  ;;  %v2906_v9 = vpop.permute.xlu0 %422 }
  0xaa   : > { %4259 = vst [vmem:[#allocation59_spill] sm:$0xff] %v2906_v9  ;;  %687 = vrot.lane.b32.xlu1 %v2417_v46, %s2252_s22 }
  0xab   : > { %685 = vrot.lane.b32.xlu0 %v2423_v48, %s2252_s22 }
  0xac   : > { %v2912_v61 = vpop.permute.xlu1 %428 }
  0xad   : > { %4260 = vst [vmem:[#allocation60_spill] sm:$0xff] %v2912_v61  ;;  %v2914_v36 = vpop.permute.xlu0 %426 }
  0xae   : > { %4261 = vst [vmem:[#allocation61_spill] sm:$0xff] %v2914_v36  ;;  %691 = vrot.lane.b32.xlu1 %v2439_v54, %s2252_s22 }
  0xaf   : > { %689 = vrot.lane.b32.xlu0 %v2445_v56, %s2252_s22 }
  0xb0   : > { %v2920_v57 = vpop.permute.xlu1 %432 }
  0xb1   : > { %v2922_v10 = vpop.permute.xlu0 %430 }
  0xb2   : > { %695 = vrot.lane.b32.xlu1 %v2461_v62, %s2252_s22 }
  0xb3   : > { %693 = vrot.lane.b32.xlu0 %v2467_v3, %s2252_s22 }
  0xb4   : > { %v2928_v9 = vpop.permute.xlu1 %436 }
  0xb5   : > { %v2930_v61 = vpop.permute.xlu0 %434 }
  0xb6   : > { %699 = vrot.lane.b32.xlu1 %v2483_v16, %s2252_s22 }
  0xb7   : > { %697 = vrot.lane.b32.xlu0 %v2489_v19, %s2252_s22 }
  0xb8   : > { %v2936_v36 = vpop.permute.xlu1 %440 }
  0xb9   : > { %v2938_v31 = vpop.permute.xlu0 %438 }
  0xba   : > { %703 = vrot.lane.b32.xlu1 %v2505_v34, %s2252_s22 }
  0xbb   : > { %701 = vrot.lane.b32.xlu0 %v2511_v37, %s2252_s22 }
  0xbc   : > { %v2944_v62 = vpop.permute.xlu1 %444 }
  0xbd   : > { %v2946_v3 = vpop.permute.xlu0 %442 }
  0xbe   : > { %707 = vrot.lane.b32.xlu1 %v2527_v53, %s2252_s22 }
  0xbf   : > { %705 = vrot.lane.b32.xlu0 %v2533_v59, %s2252_s22 }
  0xc0   : > { %v2952_v16 = vpop.permute.xlu1 %448 }
  0xc1   : > { %v2954_v19 = vpop.permute.xlu0 %446 }
  0xc2   : > { %711 = vrot.lane.b32.xlu1 %v2549_v26, %s2252_s22 }
  0xc3   : > { %709 = vrot.lane.b32.xlu0 %v2555_v20, %s2252_s22 }
  0xc4   : > { %v2960_v29 = vpop.permute.xlu1 %452 }
  0xc5   : > { %v2962_v27 = vpop.permute.xlu0 %450 }
  0xc6   : > { %4262 = vst [vmem:[#allocation62_spill] sm:$0xff] %v2962_v27  ;;  %715 = vrot.lane.b32.xlu1 %v2571_v50, %s2252_s22 }
  0xc7   : > { %713 = vrot.lane.b32.xlu0 %v2577_v13, %s2252_s22 }
  0xc8   : > { %v2968_v5 = vpop.permute.xlu1 %569 }
  0xc9   : > { %4263 = vst [vmem:[#allocation63_spill] sm:$0xff] %v2968_v5  ;;  %v2970_v23 = vpop.permute.xlu0 %567  ;;  %v2985_v5 = vld [vmem:[%s2302_s19 + $0x188] sm:$0xff] }
  0xca   : > { %4264 = vst [vmem:[#allocation64_spill] sm:$0xff] %v2970_v23  ;;  %719 = vrot.lane.b32.xlu1 %v2593_v60, %s2252_s22  ;;  %4267 = vst [vmem:[#allocation67_spill] sm:$0xff] %v2985_v5  ;;  %v1271_v23 = vsel %vm1265_vm2, %v2328_v11, %v2853_v21  ;;  %v1273_v21 = vsel %vm1265_vm2, %v2352_v22, %v2864_v52 }
  0xcb   : > { %717 = vrot.lane.b32.xlu0 %v2599_v42, %s2252_s22 }
  0xcc   : > { %v2976_v58 = vpop.permute.xlu1 %573 }
  0xcd   : > { %4265 = vst [vmem:[#allocation65_spill] sm:$0xff] %v2976_v58  ;;  %v2978_v41 = vpop.permute.xlu0 %571  ;;  %v1270_v58 = vsel %vm1265_vm2, %v2338_v15, %v2858_v63  ;;  %v1275_v63 = vsel %vm1265_vm2, %v2373_v30, %v2872_v6  ;;  %v1276_v30 = vsel %vm1265_vm2, %v2401_v40, %v2882_v47  ;;  %v1278_v40 = vsel %vm1265_vm2, %v2423_v48, %v2890_v1 }
  0xce   : > { %4266 = vst [vmem:[#allocation66_spill] sm:$0xff] %v2978_v41  ;;  %723 = vrot.lane.b32.xlu1 %v2615_v49, %s2252_s22  ;;  %v1280_v48 = vsel %vm1265_vm2, %v2445_v56, %v2898_v39  ;;  %v4275_v56 = vld [vmem:[#allocation8_spill] sm:$0xff] }
  0xcf   : > { %721 = vrot.lane.b32.xlu0 %v2621_v8, %s2252_s22 }
  0xd0   : > { %v578_v43 = vpop.permute.xlu1 %577 }
  0xd1   : > { %v2997_v41 = vsel %vm1298_vm3, %v1271_v23, %v578_v43  ;;  %v576_v35 = vpop.permute.xlu0 %575  ;;  %v1272_v43 = vsel %vm1265_vm2, %v2358_v24, %v2866_v55 }
  0xd2   : > { %v3000_v8 = vsel %vm1298_vm3, %v1270_v58, %v576_v35  ;;  %727 = vrot.lane.b32.xlu1 %v2985_v5, %s2252_s22 }
  0xd3   : > { %725 = vrot.lane.b32.xlu0 %v2991_v14, %s2252_s22 }
  0xd4   : > { %v582_v27 = vpop.permute.xlu1 %581 }
  0xd5   : > { %v3013_v23 = vsel %vm1298_vm3, %v1273_v21, %v582_v27  ;;  %v580_v35 = vpop.permute.xlu0 %579  ;;  %v1274_v27 = vsel %vm1265_vm2, %v2379_v32, %v2874_v45 }
  0xd6   : > { %v3016_v58 = vsel %vm1298_vm3, %v1272_v43, %v580_v35  ;;  %769 = vrot.lane.b32.xlu1 %v2345_v17, %s2253_s23  ;;  %v4269_v35 = vld [vmem:[#allocation2_spill] sm:$0xff] }
  0xd7   : > { %767 = vrot.lane.b32.xlu0 %v2331_v12, %s2253_s23  ;;  %v1277_v12 = vsel %vm1265_vm2, %v2395_v38, %v2880_v4  ;;  %v1279_v38 = vsel %vm1265_vm2, %v2417_v46, %v2888_v0  ;;  %v1281_v46 = vsel %vm1265_vm2, %v2439_v54, %v2896_v44  ;;  %v4274_v44 = vld [vmem:[#allocation7_spill] sm:$0xff] }
  0xd8   : > { %v586_v52 = vpop.permute.xlu1 %585 }
  0xd9   : > { %v3029_v55 = vsel %vm1298_vm3, %v1275_v63, %v586_v52  ;;  %v584_v21 = vpop.permute.xlu0 %583 }
  0xda   : > { %v3032_v43 = vsel %vm1298_vm3, %v1274_v27, %v584_v21  ;;  %773 = vrot.lane.b32.xlu1 %v2364_v25, %s2253_s23  ;;  %v4270_v27 = vld [vmem:[#allocation3_spill] sm:$0xff]  ;;  %v4271_v21 = vld [vmem:[#allocation4_spill] sm:$0xff] }
  0xdb   : > { %771 = vrot.lane.b32.xlu0 %v2369_v28, %s2253_s23 }
  0xdc   : > { %v590_v17 = vpop.permute.xlu1 %589 }
  0xdd   : > { %v3045_v32 = vsel %vm1298_vm3, %v1277_v12, %v590_v17  ;;  %v588_v6 = vpop.permute.xlu0 %587 }
  0xde   : > { %v3048_v45 = vsel %vm1298_vm3, %v1276_v30, %v588_v6  ;;  %777 = vrot.lane.b32.xlu1 %v2386_v33, %s2253_s23  ;;  %v4272_v30 = vld [vmem:[#allocation5_spill] sm:$0xff]  ;;  %v4273_v6 = vld [vmem:[#allocation6_spill] sm:$0xff] }
  0xdf   : > { %775 = vrot.lane.b32.xlu0 %v4269_v35, %s2253_s23 }
  0xe0   : > { %v594_v4 = vpop.permute.xlu1 %593 }
  0xe1   : > { %v3061_v47 = vsel %vm1298_vm3, %v1279_v38, %v594_v4  ;;  %v592_v63 = vpop.permute.xlu0 %591 }
  0xe2   : > { %v3064_v52 = vsel %vm1298_vm3, %v1278_v40, %v592_v63  ;;  %781 = vrot.lane.b32.xlu1 %v4270_v27, %s2253_s23  ;;  %v4277_v40 = vld [vmem:[#allocation9_spill] sm:$0xff]  ;;  %v4278_v63 = vld [vmem:[#allocation10_spill] sm:$0xff] }
  0xe3   : > { %779 = vrot.lane.b32.xlu0 %v4271_v21, %s2253_s23 }
  0xe4   : > { %v598_v0 = vpop.permute.xlu1 %597 }
  0xe5   : > { %v3077_v1 = vsel %vm1298_vm3, %v1281_v46, %v598_v0  ;;  %v596_v12 = vpop.permute.xlu0 %595  ;;  %v1287_v46 = vsel %vm1265_vm2, %v2505_v34, %v2920_v57  ;;  %v1289_v57 = vsel %vm1265_vm2, %v2527_v53, %v2928_v9  ;;  %v1291_v9 = vsel %vm1265_vm2, %v2549_v26, %v2936_v36 }
  0xe6   : > { %v3080_v17 = vsel %vm1298_vm3, %v1280_v48, %v596_v12  ;;  %785 = vrot.lane.b32.xlu1 %v4272_v30, %s2253_s23  ;;  %v1286_v48 = vsel %vm1265_vm2, %v2511_v37, %v2922_v10  ;;  %v1288_v10 = vsel %vm1265_vm2, %v2533_v59, %v2930_v61  ;;  %v1290_v61 = vsel %vm1265_vm2, %v2555_v20, %v2938_v31 }
  0xe7   : > { %783 = vrot.lane.b32.xlu0 %v4273_v6, %s2253_s23  ;;  %v1292_v31 = vsel %vm1265_vm2, %v2577_v13, %v2946_v3  ;;  %v1294_v3 = vsel %vm1265_vm2, %v2599_v42, %v2954_v19  ;;  %v4283_v19 = vld [vmem:[#allocation23_spill] sm:$0xff] }
  0xe8   : > { %v3086_v38 = vpop.permute.xlu1 %601 }
  0xe9   : > { %v3088_v54 = vpop.permute.xlu0 %599 }
  0xea   : > { %789 = vrot.lane.b32.xlu1 %v4274_v44, %s2253_s23 }
  0xeb   : > { %787 = vrot.lane.b32.xlu0 %v4275_v56, %s2253_s23 }
  0xec   : > { %v3094_v39 = vpop.permute.xlu1 %605 }
  0xed   : > { %4276 = vst [vmem:[#allocation2_spill] sm:$0xff] %v3094_v39  ;;  %v3096_v4 = vpop.permute.xlu0 %603 }
  0xee   : > { %793 = vrot.lane.b32.xlu1 %v4277_v40, %s2253_s23  ;;  %v4279_v40 = vld [vmem:[#allocation14_spill] sm:$0xff] }
  0xef   : > { %791 = vrot.lane.b32.xlu0 %v4278_v63, %s2253_s23  ;;  %v4280_v63 = vld [vmem:[#allocation12_spill] sm:$0xff] }
  0xf0   : > { %v610_v0 = vpop.permute.xlu1 %609 }
  0xf1   : > { %v3109_v12 = vsel %vm1298_vm3, %v1287_v46, %v610_v0  ;;  %v608_v14 = vpop.permute.xlu0 %607 }
  0xf2   : > { %v3112_v5 = vsel %vm1298_vm3, %v1286_v48, %v608_v14  ;;  %799 = vrot.lane.b32.xlu1 %v4279_v40, %s2253_s23  ;;  %v4281_v48 = vld [vmem:[#allocation13_spill] sm:$0xff] }
  0xf3   : > { %795 = vrot.lane.b32.xlu0 %v4280_v63, %s2253_s23 }
  0xf4   : > { %v614_v39 = vpop.permute.xlu1 %613 }
  0xf5   : > { %v3125_v46 = vsel %vm1298_vm3, %v1289_v57, %v614_v39  ;;  %v612_v14 = vpop.permute.xlu0 %611 }
  0xf6   : > { %v3128_v0 = vsel %vm1298_vm3, %v1288_v10, %v612_v14  ;;  %868 = vrot.lane.b32.xlu1 %v2666_v51, %s2254_s24  ;;  %v1293_v51 = vsel %vm1265_vm2, %v2571_v50, %v2944_v62 }
  0xf7   : > { %801 = vrot.lane.b32.xlu0 %v4281_v48, %s2253_s23 }
  0xf8   : > { %v618_v40 = vpop.permute.xlu1 %617 }
  0xf9   : > { %v3141_v39 = vsel %vm1298_vm3, %v1291_v9, %v618_v40  ;;  %v616_v57 = vpop.permute.xlu0 %615 }
  0xfa   : > { %v3144_v10 = vsel %vm1298_vm3, %v1290_v61, %v616_v57  ;;  %870 = vrot.lane.b32.xlu1 %v2661_v2, %s2254_s24  ;;  %v1295_v2 = vsel %vm1265_vm2, %v2593_v60, %v2952_v16  ;;  %v1297_v60 = vsel %vm1265_vm2, %v2615_v49, %v2960_v29  ;;  %v4282_v16 = vld [vmem:[#allocation62_spill] sm:$0xff]  ;;  %v1531_v49 = vld [vmem:[%s4092_s1 + $0x10] sm:$0xff] }
  0xfb   : > { %900 = vrot.lane.b32.xlu0 %v2770_v18, %s2254_s24 }
  0xfc   : > { %v622_v36 = vpop.permute.xlu1 %621 }
  0xfd   : > { %v3157_v40 = vsel %vm1298_vm3, %v1293_v51, %v622_v36  ;;  %v620_v14 = vpop.permute.xlu0 %619  ;;  %v1296_v36 = vsel %vm1265_vm2, %v4283_v19, %v4282_v16 }
  0xfe   : > { %v3160_v9 = vsel %vm1298_vm3, %v1292_v31, %v620_v14  ;;  %966 = vrot.lane.b32.xlu1 %v2338_v15, %s2255_s25  ;;  %v1533_v15 = vld [vmem:[%s4092_s1 + $0x20] sm:$0xf]  ;;  %v1532_v31 = vld [vmem:[%s4092_s1 + $0x18] sm:$0xff] }
  0xff   : > { %902 = vrot.lane.b32.xlu0 %v2765_v7, %s2254_s24  ;;  %2105 = vmatprep.subr.msk.mxu0 %vm1638_vm4, %v1533_v15 }
 0x100   : > { %v626_v62 = vpop.permute.xlu1 %625  ;;  %2163 = vmatprep.subr.msk.mxu1 %vm1638_vm4, %v1533_v15  ;;  %2106 = vmatpush3.msk.msra.mxu0 %vm1638_vm4, %v1533_v15 }
 0x101   : > { %v3173_v61 = vsel %vm1298_vm3, %v1295_v2, %v626_v62  ;;  %v624_v57 = vpop.permute.xlu0 %623  ;;  %2168 = vmatpush3.msk.msra.mxu1 %vm1638_vm4, %v1533_v15  ;;  %2107 = vmatprep.subr.mxu0 %v1532_v31  ;;  %v4284_v62 = vld [vmem:[#allocation16_spill] sm:$0xff]  ;;  %v4285_v15 = vld [vmem:[#allocation15_spill] sm:$0xff] }
 0x102   : > { %v3176_v51 = vsel %vm1298_vm3, %v1294_v3, %v624_v57  ;;  %968 = vrot.lane.b32.xlu1 %v2328_v11, %s2255_s25  ;;  %2108 = vmatpush3.msra.mxu0 %v1532_v31 }
 0x103   : > { %998 = vrot.lane.b32.xlu0 %v2511_v37, %s2255_s25  ;;  %2109 = vmatprep.subr.mxu0 %v1531_v49 }
 0x104   : > { %v630_v42 = vpop.permute.xlu1 %629  ;;  %2164 = vmatprep.subr.mxu1 %v1532_v31  ;;  %2110 = vmatpush3.msra.mxu0 %v1531_v49 }
 0x105   : > { %v3192_v11 = vsel %vm1298_vm3, %v1297_v60, %v630_v42  ;;  %v628_v37 = vpop.permute.xlu0 %627  ;;  %2169 = vmatpush3.msra.mxu1 %v1532_v31 }
 0x106   : > { %v3198_v14 = vsel %vm1298_vm3, %v1296_v36, %v628_v37  ;;  %1068 = vrot.lane.b32.xlu1 %v2369_v28, %s2256_s30  ;;  %v1530_v28 = vld [vmem:[%s4092_s1 + $0x8] sm:$0xff]  ;;  %2165 = vmatprep.subr.mxu1 %v1531_v49 }
 0x107   : > { %1000 = vrot.lane.b32.xlu0 %v2505_v34, %s2255_s25  ;;  %2111 = vmatprep.subr.mxu0 %v1530_v28  ;;  %v1529_v34 = vld [vmem:[%s4092_s1] sm:$0xff]  ;;  %v4286_v36 = vld [vmem:[#allocation43_spill] sm:$0xff] }
 0x108   : > { %v3207_v29 = vpop.permute.xlu1 %667  ;;  %2112 = vmatpush3.msra.mxu0 %v1530_v28  ;;  %2170 = vmatpush3.msra.mxu1 %v1531_v49 }
 0x109   : > { %v3209_v2 = vpop.permute.xlu0 %665  ;;  %2113 = vmatprep.subr.mxu0 %v1529_v34  ;;  %2166 = vmatprep.subr.mxu1 %v1530_v28 }
 0x10a   : > { %803 = vrot.lane.b32.xlu1 %v4284_v62, %s2253_s23  ;;  %2114 = vmatpush3.msra.mxu0 %v1529_v34 }
 0x10b   : > { %1100 = vrot.lane.b32.xlu0 %v4284_v62, %s2256_s30  ;;  %2171 = vmatpush3.msra.mxu1 %v1530_v28 }
 0x10c   : > { %v3221_v3 = vpop.permute.xlu1 %671  ;;  %2167 = vmatprep.subr.mxu1 %v1529_v34 }
 0x10d   : > { %v3223_v57 = vpop.permute.xlu0 %669  ;;  %2172 = vmatpush3.msra.mxu1 %v1529_v34  ;;  %v4289_v34 = vld [vmem:[#allocation28_spill] sm:$0xff] }
 0x10e   : > { %1102 = vrot.lane.b32.xlu1 %v4285_v15, %s2256_s30 }
 0x10f   : > { %1070 = vrot.lane.b32.xlu0 %v2364_v25, %s2256_s30  ;;  %v4287_v25 = vld [vmem:[#allocation29_spill] sm:$0xff] }
 0x110   : > { %v676_v60 = vpop.permute.xlu1 %675 }
 0x111   : > { %v3231_v42 = vsel %vm1331_vm5, %v2997_v41, %v676_v60  ;;  %v674_v16 = vpop.permute.xlu0 %673 }
 0x112   : > { %v3235_v19 = vsel %vm1331_vm5, %v3000_v8, %v674_v16  ;;  %1201 = vrot.lane.b32.xlu1 %v4286_v36, %s2257_s10 }
 0x113   : > { %1169 = vrot.lane.b32.xlu0 %v4287_v25, %s2257_s10 }
 0x114   : > { %v680_v37 = vpop.permute.xlu1 %679 }
 0x115   : > { %v3243_v31 = vsel %vm1331_vm5, %v3013_v23, %v680_v37  ;;  %v678_v41 = vpop.permute.xlu0 %677 }
 0x116   : > { %v3247_v49 = vsel %vm1331_vm5, %v3016_v58, %v678_v41  ;;  %872 = vrot.lane.b32.xlu1 %v4287_v25, %s2254_s24 }
 0x117   : > { %805 = vrot.lane.b32.xlu0 %v4285_v15, %s2253_s23 }
 0x118   : > { %v684_v8 = vpop.permute.xlu1 %683 }
 0x119   : > { %v3255_v62 = vsel %vm1331_vm5, %v3029_v55, %v684_v8  ;;  %v682_v28 = vpop.permute.xlu0 %681  ;;  %v4297_v8 = vld [vmem:[#allocation18_spill] sm:$0xff] }
 0x11a   : > { %4288 = vst [vmem:[#allocation3_spill] sm:$0xff] %v3255_v62  ;;  %v3259_v23 = vsel %vm1331_vm5, %v3032_v43, %v682_v28  ;;  %1171 = vrot.lane.b32.xlu1 %v4289_v34, %s2257_s10  ;;  %v4292_v43 = vld [vmem:[#allocation42_spill] sm:$0xff] }
 0x11b   : > { %904 = vrot.lane.b32.xlu0 %v4286_v36, %s2254_s24 }
 0x11c   : > { %v688_v58 = vpop.permute.xlu1 %687 }
 0x11d   : > { %v3267_v15 = vsel %vm1331_vm5, %v3045_v32, %v688_v58  ;;  %v686_v60 = vpop.permute.xlu0 %685 }
 0x11e   : > { %4290 = vst [vmem:[#allocation4_spill] sm:$0xff] %v3267_v15  ;;  %v3271_v55 = vsel %vm1331_vm5, %v3048_v45, %v686_v60  ;;  %874 = vrot.lane.b32.xlu1 %v4289_v34, %s2254_s24  ;;  %v4325_v15 = vld [vmem:[#allocation51_spill] sm:$0xff] }
 0x11f   : > { %4291 = vst [vmem:[#allocation5_spill] sm:$0xff] %v3271_v55  ;;  %1203 = vrot.lane.b32.xlu0 %v4292_v43, %s2257_s10 }
 0x120   : > { %v692_v16 = vpop.permute.xlu1 %691 }
 0x121   : > { %v3279_v36 = vsel %vm1331_vm5, %v3061_v47, %v692_v16  ;;  %v690_v25 = vpop.permute.xlu0 %689 }
 0x122   : > { %4293 = vst [vmem:[#allocation6_spill] sm:$0xff] %v3279_v36  ;;  %v3283_v32 = vsel %vm1331_vm5, %v3064_v52, %v690_v25  ;;  %970 = vrot.lane.b32.xlu1 %v2358_v24, %s2255_s25  ;;  %v2209_v36 = vld [vmem:[%s2302_s19 + $0x80] sm:$0xff] }
 0x123   : > { %4294 = vst [vmem:[#allocation7_spill] sm:$0xff] %v3283_v32  ;;  %906 = vrot.lane.b32.xlu0 %v4292_v43, %s2254_s24  ;;  %v4299_v43 = vld [vmem:[#allocation45_spill] sm:$0xff]  ;;  %v3482_v32 = vld [vmem:[%s2302_s19 + $0xc0] sm:$0xff] }
 0x124   : > { %v696_v45 = vpop.permute.xlu1 %695 }
 0x125   : > { %v3291_v37 = vsel %vm1331_vm5, %v3077_v1, %v696_v45  ;;  %v694_v41 = vpop.permute.xlu0 %693 }
 0x126   : > { %4295 = vst [vmem:[#allocation8_spill] sm:$0xff] %v3291_v37  ;;  %v3295_v47 = vsel %vm1331_vm5, %v3080_v17, %v694_v41  ;;  %972 = vrot.lane.b32.xlu1 %v2352_v22, %s2255_s25 }
 0x127   : > { %4296 = vst [vmem:[#allocation12_spill] sm:$0xff] %v3295_v47  ;;  %1002 = vrot.lane.b32.xlu0 %v2533_v59, %s2255_s25  ;;  %v2208_v47 = vld [vmem:[%s2302_s19 + $0x78] sm:$0xff] }
 0x128   : > { %v3301_v24 = vpop.permute.xlu1 %699 }
 0x129   : > { %v3303_v52 = vpop.permute.xlu0 %697 }
 0x12a   : > { %1072 = vrot.lane.b32.xlu1 %v4269_v35, %s2256_s30 }
 0x12b   : > { %1004 = vrot.lane.b32.xlu0 %v2527_v53, %s2255_s25  ;;  %v4298_v53 = vld [vmem:[#allocation17_spill] sm:$0xff] }
 0x12c   : > { %v3309_v1 = vpop.permute.xlu1 %703 }
 0x12d   : > { %v3311_v17 = vpop.permute.xlu0 %701 }
 0x12e   : > { %807 = vrot.lane.b32.xlu1 %v4297_v8, %s2253_s23 }
 0x12f   : > { %1104 = vrot.lane.b32.xlu0 %v4297_v8, %s2256_s30 }
 0x130   : > { %v708_v22 = vpop.permute.xlu1 %707 }
 0x131   : > { %v3319_v59 = vsel %vm1331_vm5, %v3109_v12, %v708_v22  ;;  %v706_v28 = vpop.permute.xlu0 %705 }
 0x132   : > { %v3323_v35 = vsel %vm1331_vm5, %v3112_v5, %v706_v28  ;;  %1106 = vrot.lane.b32.xlu1 %v4298_v53, %s2256_s30  ;;  %v4300_v5 = vld [vmem:[#allocation31_spill] sm:$0xff] }
 0x133   : > { %1074 = vrot.lane.b32.xlu0 %v2386_v33, %s2256_s30 }
 0x134   : > { %v712_v34 = vpop.permute.xlu1 %711 }
 0x135   : > { %v3331_v58 = vsel %vm1331_vm5, %v3125_v46, %v712_v34  ;;  %v710_v60 = vpop.permute.xlu0 %709 }
 0x136   : > { %v3335_v12 = vsel %vm1331_vm5, %v3128_v0, %v710_v60  ;;  %1205 = vrot.lane.b32.xlu1 %v4299_v43, %s2257_s10 }
 0x137   : > { %1173 = vrot.lane.b32.xlu0 %v4300_v5, %s2257_s10 }
 0x138   : > { %v716_v16 = vpop.permute.xlu1 %715 }
 0x139   : > { %v3343_v33 = vsel %vm1331_vm5, %v3141_v39, %v716_v16  ;;  %v714_v25 = vpop.permute.xlu0 %713  ;;  %v2207_v16 = vld [vmem:[%s2302_s19 + $0x68] sm:$0xff] }
 0x13a   : > { %4301 = vst [vmem:[#allocation13_spill] sm:$0xff] %v3343_v33  ;;  %v3347_v46 = vsel %vm1331_vm5, %v3144_v10, %v714_v25  ;;  %876 = vrot.lane.b32.xlu1 %v4300_v5, %s2254_s24  ;;  %v4304_v10 = vld [vmem:[#allocation30_spill] sm:$0xff] }
 0x13b   : > { %809 = vrot.lane.b32.xlu0 %v4298_v53, %s2253_s23 }
 0x13c   : > { %v720_v0 = vpop.permute.xlu1 %719 }
 0x13d   : > { %v3355_v45 = vsel %vm1331_vm5, %v3157_v40, %v720_v0  ;;  %v718_v41 = vpop.permute.xlu0 %717 }
 0x13e   : > { %4302 = vst [vmem:[#allocation62_spill] sm:$0xff] %v3355_v45  ;;  %v3359_v39 = vsel %vm1331_vm5, %v3160_v9, %v718_v41  ;;  %1175 = vrot.lane.b32.xlu1 %v4304_v10, %s2257_s10  ;;  %v4307_v9 = vld [vmem:[#allocation44_spill] sm:$0xff]  ;;  %v2211_v45 = vld [vmem:[%s2302_s19] sm:$0xff] }
 0x13f   : > { %4303 = vst [vmem:[#allocation23_spill] sm:$0xff] %v3359_v39  ;;  %908 = vrot.lane.b32.xlu0 %v4299_v43, %s2254_s24  ;;  %v2206_v43 = vld [vmem:[%s2302_s19 + $0x60] sm:$0xff]  ;;  %v4310_v41 = vld [vmem:[#allocation20_spill] sm:$0xff] }
 0x140   : > { %v724_v8 = vpop.permute.xlu1 %723 }
 0x141   : > { %v3367_v22 = vsel %vm1331_vm5, %v3173_v61, %v724_v8  ;;  %v722_v28 = vpop.permute.xlu0 %721  ;;  %v4311_v8 = vld [vmem:[#allocation19_spill] sm:$0xff] }
 0x142   : > { %4305 = vst [vmem:[#allocation16_spill] sm:$0xff] %v3367_v22  ;;  %v3371_v40 = vsel %vm1331_vm5, %v3176_v51, %v722_v28  ;;  %878 = vrot.lane.b32.xlu1 %v4304_v10, %s2254_s24  ;;  %v4312_v28 = vld [vmem:[#allocation47_spill] sm:$0xff]  ;;  %v4322_v22 = vld [vmem:[#allocation21_spill] sm:$0xff] }
 0x143   : > { %4306 = vst [vmem:[#allocation15_spill] sm:$0xff] %v3371_v40  ;;  %1207 = vrot.lane.b32.xlu0 %v4307_v9, %s2257_s10 }
 0x144   : > { %v728_v53 = vpop.permute.xlu1 %727 }
 0x145   : > { %v3379_v34 = vsel %vm1331_vm5, %v3192_v11, %v728_v53  ;;  %v726_v60 = vpop.permute.xlu0 %725 }
 0x146   : > { %4308 = vst [vmem:[#allocation43_spill] sm:$0xff] %v3379_v34  ;;  %v3383_v61 = vsel %vm1331_vm5, %v3198_v14, %v726_v60  ;;  %974 = vrot.lane.b32.xlu1 %v2206_v43, %s2255_s25 }
 0x147   : > { %4309 = vst [vmem:[#allocation29_spill] sm:$0xff] %v3383_v61  ;;  %910 = vrot.lane.b32.xlu0 %v4307_v9, %s2254_s24  ;;  %v4313_v9 = vld [vmem:[#allocation33_spill] sm:$0xff] }
 0x148   : > { %v3389_v51 = vpop.permute.xlu1 %769 }
 0x149   : > { %v3391_v5 = vpop.permute.xlu0 %767 }
 0x14a   : > { %976 = vrot.lane.b32.xlu1 %v2207_v16, %s2255_s25  ;;  %v4318_v16 = vld [vmem:[#allocation32_spill] sm:$0xff] }
 0x14b   : > { %1006 = vrot.lane.b32.xlu0 %v2555_v20, %s2255_s25 }
 0x14c   : > { %v3397_v11 = vpop.permute.xlu1 %773 }
 0x14d   : > { %v3399_v14 = vpop.permute.xlu0 %771 }
 0x14e   : > { %1076 = vrot.lane.b32.xlu1 %v4271_v21, %s2256_s30 }
 0x14f   : > { %1008 = vrot.lane.b32.xlu0 %v2549_v26, %s2255_s25 }
 0x150   : > { %v3405_v25 = vpop.permute.xlu1 %777 }
 0x151   : > { %v3407_v0 = vpop.permute.xlu0 %775 }
 0x152   : > { %811 = vrot.lane.b32.xlu1 %v4310_v41, %s2253_s23 }
 0x153   : > { %1108 = vrot.lane.b32.xlu0 %v4310_v41, %s2256_s30 }
 0x154   : > { %v3413_v20 = vpop.permute.xlu1 %781 }
 0x155   : > { %v3415_v10 = vpop.permute.xlu0 %779 }
 0x156   : > { %1110 = vrot.lane.b32.xlu1 %v4311_v8, %s2256_s30 }
 0x157   : > { %1078 = vrot.lane.b32.xlu0 %v4270_v27, %s2256_s30 }
 0x158   : > { %v3421_v26 = vpop.permute.xlu1 %785 }
 0x159   : > { %v3423_v21 = vpop.permute.xlu0 %783 }
 0x15a   : > { %1209 = vrot.lane.b32.xlu1 %v4312_v28, %s2257_s10 }
 0x15b   : > { %1177 = vrot.lane.b32.xlu0 %v4313_v9, %s2257_s10 }
 0x15c   : > { %v3429_v53 = vpop.permute.xlu1 %789 }
 0x15d   : > { %4314 = vst [vmem:[#allocation28_spill] sm:$0xff] %v3429_v53  ;;  %v3431_v60 = vpop.permute.xlu0 %787  ;;  %v1266_v53 = vsel %vm1265_vm2, %v2211_v45, %v4325_v15 }
 0x15e   : > { %4315 = vst [vmem:[#allocation42_spill] sm:$0xff] %v3431_v60  ;;  %880 = vrot.lane.b32.xlu1 %v4313_v9, %s2254_s24  ;;  %v4320_v9 = vld [vmem:[#allocation46_spill] sm:$0xff]  ;;  %v4327_v60 = vld [vmem:[#allocation64_spill] sm:$0xff] }
 0x15f   : > { %813 = vrot.lane.b32.xlu0 %v4311_v8, %s2253_s23  ;;  %v1299_v39 = vsel %vm1298_vm3, %v1266_v53, %v4327_v60 }
 0x160   : > { %v3437_v27 = vpop.permute.xlu1 %793  ;;  %v1332_v62 = vsel %vm1331_vm5, %v1299_v39, %v3209_v2 }
 0x161   : > { %4316 = vst [vmem:[#allocation18_spill] sm:$0xff] %v3437_v27  ;;  %v3439_v43 = vpop.permute.xlu0 %791  ;;  %v4321_v27 = vld [vmem:[#allocation22_spill] sm:$0xff] }
 0x162   : > { %4317 = vst [vmem:[#allocation17_spill] sm:$0xff] %v3439_v43  ;;  %1179 = vrot.lane.b32.xlu1 %v4318_v16, %s2257_s10  ;;  %v4323_v43 = vld [vmem:[#allocation59_spill] sm:$0xff] }
 0x163   : > { %912 = vrot.lane.b32.xlu0 %v4312_v28, %s2254_s24  ;;  %v1282_v40 = vsel %vm1265_vm2, %v3482_v32, %v4323_v43 }
 0x164   : > { %v800_v41 = vpop.permute.xlu1 %799  ;;  %v1315_v55 = vsel %vm1298_vm3, %v1282_v40, %v3088_v54  ;;  %v1365_v54 = vsel %vm1364_vm6, %v1332_v62, %v3391_v5 }
 0x165   : > { %v3445_v37 = vpop.permute.xlu0 %795  ;;  %v1348_v43 = vsel %vm1331_vm5, %v1315_v55, %v3303_v52 }
 0x166   : > { %4319 = vst [vmem:[#allocation45_spill] sm:$0xff] %v3445_v37  ;;  %882 = vrot.lane.b32.xlu1 %v4318_v16, %s2254_s24  ;;  %v1381_v15 = vsel %vm1364_vm6, %v1348_v43, %v800_v41  ;;  %v2212_v41 = vld [vmem:[%s2302_s19 + $0x8] sm:$0xff] }
 0x167   : > { %1211 = vrot.lane.b32.xlu0 %v4320_v9, %s2257_s10 }
 0x168   : > { %v869_v8 = vpop.permute.xlu1 %868 }
 0x169   : > { %v3451_v34 = vpop.permute.xlu0 %801  ;;  %v1398_v55 = vsel %vm1397_vm7, %v1365_v54, %v869_v8 }
 0x16a   : > { %978 = vrot.lane.b32.xlu1 %v2208_v47, %s2255_s25 }
 0x16b   : > { %914 = vrot.lane.b32.xlu0 %v4320_v9, %s2254_s24 }
 0x16c   : > { %v3457_v61 = vpop.permute.xlu1 %870 }
 0x16d   : > { %v901_v28 = vpop.permute.xlu0 %900 }
 0x16e   : > { %980 = vrot.lane.b32.xlu1 %v2209_v36, %s2255_s25  ;;  %v1414_v40 = vsel %vm1397_vm7, %v1381_v15, %v901_v28  ;;  %v4328_v28 = vld [vmem:[#allocation55_spill] sm:$0xff] }
 0x16f   : > { %1010 = vrot.lane.b32.xlu0 %v2577_v13, %s2255_s25  ;;  %v1267_v8 = vsel %vm1265_vm2, %v2212_v41, %v4328_v28  ;;  %v2215_v28 = vld [vmem:[%s2302_s19 + $0x98] sm:$0xff] }
 0x170   : > { %v967_v16 = vpop.permute.xlu1 %966 }
 0x171   : > { %v3463_v37 = vpop.permute.xlu0 %902  ;;  %v1431_v2 = vsel %vm1430_vm8, %v1398_v55, %v967_v16  ;;  %v4330_v16 = vld [vmem:[#allocation63_spill] sm:$0xff] }
 0x172   : > { %1080 = vrot.lane.b32.xlu1 %v4273_v6, %s2256_s30 }
 0x173   : > { %1012 = vrot.lane.b32.xlu0 %v2571_v50, %s2255_s25 }
 0x174   : > { %v969_v47 = vpop.permute.xlu1 %968 }
 0x175   : > { %v999_v9 = vpop.permute.xlu0 %998 }
 0x176   : > { %815 = vrot.lane.b32.xlu1 %v4321_v27, %s2253_s23  ;;  %v1447_v52 = vsel %vm1430_vm8, %v1414_v40, %v999_v9  ;;  %v4329_v9 = vld [vmem:[#allocation34_spill] sm:$0xff] }
 0x177   : > { %1112 = vrot.lane.b32.xlu0 %v4321_v27, %s2256_s30  ;;  %v4324_v27 = vld [vmem:[#allocation50_spill] sm:$0xff] }
 0x178   : > { %v1069_v36 = vpop.permute.xlu1 %1068  ;;  %v4331_v40 = vld [vmem:[#allocation58_spill] sm:$0xff] }
 0x179   : > { %v3473_v13 = vpop.permute.xlu0 %1000  ;;  %v1464_v5 = vsel %vm1463_vm9, %v1431_v2, %v1069_v36 }
 0x17a   : > { %1114 = vrot.lane.b32.xlu1 %v4322_v22, %s2256_s30 }
 0x17b   : > { %1082 = vrot.lane.b32.xlu0 %v4272_v30, %s2256_s30  ;;  %v4326_v30 = vld [vmem:[#allocation35_spill] sm:$0xff] }
 0x17c   : > { %v3479_v6 = vpop.permute.xlu1 %803 }
 0x17d   : > { %v1101_v50 = vpop.permute.xlu0 %1100 }
 0x17e   : > { %1213 = vrot.lane.b32.xlu1 %v4324_v27, %s2257_s10  ;;  %v1480_v39 = vsel %vm1463_vm9, %v1447_v52, %v1101_v50  ;;  %v1300_v50 = vsel %vm1298_vm3, %v1267_v8, %v4330_v16  ;;  %v4332_v52 = vld [vmem:[#allocation48_spill] sm:$0xff]  ;;  %v4333_v16 = vld [vmem:[#allocation25_spill] sm:$0xff] }
 0x17f   : > { %1181 = vrot.lane.b32.xlu0 %v4326_v30, %s2257_s10  ;;  %v1333_v36 = vsel %vm1331_vm5, %v1300_v50, %v3207_v29  ;;  %v2216_v8 = vld [vmem:[%s2302_s19 + $0x150] sm:$0xff] }
 0x180   : > { %v1103_v33 = vpop.permute.xlu1 %1102  ;;  %v1366_v43 = vsel %vm1364_vm6, %v1333_v36, %v3389_v51 }
 0x181   : > { %v1071_v45 = vpop.permute.xlu0 %1070  ;;  %v1399_v54 = vsel %vm1397_vm7, %v1366_v43, %v3457_v61  ;;  %v4334_v43 = vld [vmem:[#allocation24_spill] sm:$0xff] }
 0x182   : > { %884 = vrot.lane.b32.xlu1 %v4326_v30, %s2254_s24  ;;  %v1432_v55 = vsel %vm1430_vm8, %v1399_v54, %v969_v47 }
 0x183   : > { %817 = vrot.lane.b32.xlu0 %v4322_v22, %s2253_s23  ;;  %v1465_v2 = vsel %vm1463_vm9, %v1432_v55, %v1071_v45 }
 0x184   : > { %v1202_v62 = vpop.permute.xlu1 %1201 }
 0x185   : > { %v1170_v53 = vpop.permute.xlu0 %1169  ;;  %v1513_v60 = vsel %vm1496_vm10, %v1480_v39, %v1202_v62 }
 0x186   : > { %1183 = vrot.lane.b32.xlu1 %v4329_v9, %s2257_s10  ;;  %v1497_v22 = vsel %vm1496_vm10, %v1464_v5, %v1170_v53  ;;  %2139 = vmatprep.mubr.msk.f32.mxu1 %vm1541_vm11, %v1513_v60  ;;  %v2214_v53 = vld [vmem:[%s2302_s19 + $0x90] sm:$0xff] }
 0x187   : > { %916 = vrot.lane.b32.xlu0 %v4324_v27, %s2254_s24  ;;  %2115 = vmatprep.mubr.msk.f32.mxu0 %vm1541_vm11, %v1497_v22  ;;  %v3541_v27 = vld [vmem:[%s2302_s19 + $0xc8] sm:$0xff] }
 0x188   : > { %v3530_v30 = vpop.permute.xlu1 %872  ;;  %v1283_v29 = vsel %vm1265_vm2, %v3541_v27, %v4331_v40  ;;  %v3590_v40 = vld [vmem:[%s2302_s19 + $0xd8] sm:$0xff] }
 0x189   : > { %v3534_v15 = vpop.permute.xlu0 %805  ;;  %v1316_v51 = vsel %vm1298_vm3, %v1283_v29, %v3086_v38  ;;  %v4335_v29 = vld [vmem:[#allocation61_spill] sm:$0xff] }
 0x18a   : > { %886 = vrot.lane.b32.xlu1 %v4329_v9, %s2254_s24  ;;  %v1349_v39 = vsel %vm1331_vm5, %v1316_v51, %v3301_v24  ;;  %v1284_v55 = vsel %vm1265_vm2, %v3590_v40, %v4335_v29  ;;  %v2219_v51 = vld [vmem:[%s2302_s19 + $0x18] sm:$0xff] }
 0x18b   : > { %1215 = vrot.lane.b32.xlu0 %v4332_v52, %s2257_s10  ;;  %v1382_v47 = vsel %vm1364_vm6, %v1349_v39, %v3451_v34  ;;  %v1317_v39 = vsel %vm1298_vm3, %v1284_v55, %v3096_v4  ;;  %v4340_v29 = vld [vmem:[#allocation53_spill] sm:$0xff]  ;;  %v4341_v55 = vld [vmem:[#allocation36_spill] sm:$0xff] }
 0x18c   : > { %v1172_v61 = vpop.permute.xlu1 %1171  ;;  %v1415_v38 = vsel %vm1397_vm7, %v1382_v47, %v3463_v37 }
 0x18d   : > { %v1498_v62 = vsel %vm1496_vm10, %v1465_v2, %v1172_v61  ;;  %v905_v5 = vpop.permute.xlu0 %904  ;;  %v1448_v24 = vsel %vm1430_vm8, %v1415_v38, %v3473_v13  ;;  %v4337_v2 = vld [vmem:[#allocation49_spill] sm:$0xff] }
 0x18e   : > { %982 = vrot.lane.b32.xlu1 %v2214_v53, %s2255_s25  ;;  %2116 = vmatmul.mubr.msk.f32.vlgmr.msra.gmra.mxu0 %vm1541_vm11, %v1498_v62  ;;  %v1481_v60 = vsel %vm1463_vm9, %v1448_v24, %v1103_v33  ;;  %v2217_v33 = vld [vmem:[%s2302_s19 + $0x158] sm:$0xff]  ;;  %v1268_v61 = vsel %vm1265_vm2, %v2219_v51, %v4337_v2  ;;  %v4339_v62 = vld [vmem:[#allocation66_spill] sm:$0xff]  ;;  %v1350_v53 = vsel %vm1331_vm5, %v1317_v39, %v3311_v17 }
 0x18f   : > { %918 = vrot.lane.b32.xlu0 %v4332_v52, %s2254_s24  ;;  %v4336_v52 = vld [vmem:[#allocation54_spill] sm:$0xff]  ;;  %v1301_v47 = vsel %vm1298_vm3, %v1268_v61, %v4339_v62  ;;  %v4344_v62 = vld [vmem:[#allocation52_spill] sm:$0xff] }
 0x190   : > { %v875_v45 = vpop.permute.xlu1 %874  ;;  %v1334_v24 = vsel %vm1331_vm5, %v1301_v47, %v3223_v57  ;;  %v3648_v39 = vld [vmem:[%s2302_s19 + $0xe0] sm:$0xff] }
 0x191   : > { %v1204_v41 = vpop.permute.xlu0 %1203  ;;  %v1367_v4 = vsel %vm1364_vm6, %v1334_v24, %v3399_v14  ;;  %v4345_v47 = vld [vmem:[#allocation2_spill] sm:$0xff] }
 0x192   : > { %v1514_v34 = vsel %vm1496_vm10, %v1481_v60, %v1204_v41  ;;  %984 = vrot.lane.b32.xlu1 %v2215_v28, %s2255_s25  ;;  %v1383_v60 = vsel %vm1364_vm6, %v1350_v53, %v3479_v6  ;;  %v1400_v17 = vsel %vm1397_vm7, %v1367_v4, %v3530_v30 }
 0x193   : > { %1014 = vrot.lane.b32.xlu0 %v2216_v8, %s2255_s25  ;;  %2140 = vmatmul.mubr.msk.f32.vlgmr.msra.gmra.mxu1 %vm1541_vm11, %v1514_v34  ;;  %v1416_v34 = vsel %vm1397_vm7, %v1383_v60, %v905_v5 }
 0x194   : > { %v971_v37 = vpop.permute.xlu1 %970 }
 0x195   : > { %v3573_v9 = vpop.permute.xlu0 %906  ;;  %v1433_v57 = vsel %vm1430_vm8, %v1400_v17, %v971_v37  ;;  %v4342_v37 = vld [vmem:[#allocation65_spill] sm:$0xff] }
 0x196   : > { %1084 = vrot.lane.b32.xlu1 %v4275_v56, %s2256_s30 }
 0x197   : > { %1016 = vrot.lane.b32.xlu0 %v2217_v33, %s2255_s25 }
 0x198   : > { %v973_v13 = vpop.permute.xlu1 %972 }
 0x199   : > { %v1003_v22 = vpop.permute.xlu0 %1002 }
 0x19a   : > { %819 = vrot.lane.b32.xlu1 %v4333_v16, %s2253_s23  ;;  %v1449_v28 = vsel %vm1430_vm8, %v1416_v34, %v1003_v22  ;;  %v2222_v34 = vld [vmem:[%s2302_s19 + $0xa8] sm:$0xff] }
 0x19b   : > { %1116 = vrot.lane.b32.xlu0 %v4333_v16, %s2256_s30  ;;  %v2220_v16 = vld [vmem:[%s2302_s19 + $0x20] sm:$0xff] }
 0x19c   : > { %v1073_v50 = vpop.permute.xlu1 %1072  ;;  %v1269_v30 = vsel %vm1265_vm2, %v2220_v16, %v4340_v29  ;;  %v4347_v16 = vld [vmem:[#allocation27_spill] sm:$0xff] }
 0x19d   : > { %v1005_v36 = vpop.permute.xlu0 %1004  ;;  %v1466_v14 = vsel %vm1463_vm9, %v1433_v57, %v1073_v50 }
 0x19e   : > { %1118 = vrot.lane.b32.xlu1 %v4334_v43, %s2256_s30 }
 0x19f   : > { %1086 = vrot.lane.b32.xlu0 %v4274_v44, %s2256_s30  ;;  %v4338_v44 = vld [vmem:[#allocation37_spill] sm:$0xff] }
 0x1a0   : > { %v3587_v56 = vpop.permute.xlu1 %807 }
 0x1a1   : > { %v1105_v54 = vpop.permute.xlu0 %1104 }
 0x1a2   : > { %1217 = vrot.lane.b32.xlu1 %v4336_v52, %s2257_s10  ;;  %v1482_v6 = vsel %vm1463_vm9, %v1449_v28, %v1105_v54 }
 0x1a3   : > { %1185 = vrot.lane.b32.xlu0 %v4338_v44, %s2257_s10 }
 0x1a4   : > { %v1107_v38 = vpop.permute.xlu1 %1106 }
 0x1a5   : > { %v1075_v41 = vpop.permute.xlu0 %1074 }
 0x1a6   : > { %888 = vrot.lane.b32.xlu1 %v4338_v44, %s2254_s24 }
 0x1a7   : > { %821 = vrot.lane.b32.xlu0 %v4334_v43, %s2253_s23  ;;  %v1302_v43 = vsel %vm1298_vm3, %v1269_v30, %v4342_v37 }
 0x1a8   : > { %v1206_v8 = vpop.permute.xlu1 %1205  ;;  %v1335_v50 = vsel %vm1331_vm5, %v1302_v43, %v3221_v3 }
 0x1a9   : > { %v1515_v5 = vsel %vm1496_vm10, %v1482_v6, %v1206_v8  ;;  %v1174_v33 = vpop.permute.xlu0 %1173  ;;  %v1368_v51 = vsel %vm1364_vm6, %v1335_v50, %v3397_v11  ;;  %v2223_v6 = vld [vmem:[%s2302_s19 + $0xb0] sm:$0xff]  ;;  %v2224_v8 = vld [vmem:[%s2302_s19 + $0x168] sm:$0xff]  ;;  %v4350_v50 = vld [vmem:[#allocation57_spill] sm:$0xff] }
 0x1aa   : > { %v1499_v22 = vsel %vm1496_vm10, %v1466_v14, %v1174_v33  ;;  %1187 = vrot.lane.b32.xlu1 %v4341_v55, %s2257_s10  ;;  %2142 = vmatprep.mubr.msk.f32.mxu1 %vm1541_vm11, %v1515_v5  ;;  %v1401_v61 = vsel %vm1397_vm7, %v1368_v51, %v875_v45  ;;  %v4346_v5 = vld [vmem:[#allocation10_spill] sm:$0xff]  ;;  %v4351_v51 = vld [vmem:[#allocation39_spill] sm:$0xff] }
 0x1ab   : > { %920 = vrot.lane.b32.xlu0 %v4336_v52, %s2254_s24  ;;  %2118 = vmatprep.mubr.msk.f32.mxu0 %vm1541_vm11, %v1499_v22  ;;  %v4343_v52 = vld [vmem:[#allocation60_spill] sm:$0xff]  ;;  %v1434_v3 = vsel %vm1430_vm8, %v1401_v61, %v973_v13  ;;  %v4348_v22 = vld [vmem:[#allocation26_spill] sm:$0xff] }
 0x1ac   : > { %v877_v54 = vpop.permute.xlu1 %876  ;;  %v1285_v44 = vsel %vm1265_vm2, %v3648_v39, %v4343_v52  ;;  %v1467_v53 = vsel %vm1463_vm9, %v1434_v3, %v1075_v41  ;;  %v1385_v52 = vsel %vm1364_vm6, %v3323_v35, %v3587_v56  ;;  %v1369_v3 = vsel %vm1364_vm6, %v3235_v19, %v3407_v0 }
 0x1ad   : > { %v3642_v2 = vpop.permute.xlu0 %809  ;;  %v1318_v11 = vsel %vm1298_vm3, %v1285_v44, %v4345_v47  ;;  %v1402_v47 = vsel %vm1397_vm7, %v1369_v3, %v877_v54 }
 0x1ae   : > { %890 = vrot.lane.b32.xlu1 %v4341_v55, %s2254_s24  ;;  %v1351_v24 = vsel %vm1331_vm5, %v1318_v11, %v3309_v1  ;;  %v4349_v55 = vld [vmem:[#allocation9_spill] sm:$0xff] }
 0x1af   : > { %1219 = vrot.lane.b32.xlu0 %v4344_v62, %s2257_s10  ;;  %v1384_v13 = vsel %vm1364_vm6, %v1351_v24, %v3534_v15 }
 0x1b0   : > { %v1176_v45 = vpop.permute.xlu1 %1175  ;;  %v1417_v41 = vsel %vm1397_vm7, %v1384_v13, %v3573_v9 }
 0x1b1   : > { %v1500_v60 = vsel %vm1496_vm10, %v1467_v53, %v1176_v45  ;;  %v909_v4 = vpop.permute.xlu0 %908  ;;  %v1450_v1 = vsel %vm1430_vm8, %v1417_v41, %v1005_v36  ;;  %v2225_v36 = vld [vmem:[%s2302_s19 + $0x170] sm:$0xff] }
 0x1b2   : > { %986 = vrot.lane.b32.xlu1 %v2222_v34, %s2255_s25  ;;  %2119 = vmatmul.mubr.msk.f32.gmra.mxu0 %vm1541_vm11, %v1500_v60  ;;  %v1483_v28 = vsel %vm1463_vm9, %v1450_v1, %v1107_v38  ;;  %v4352_v60 = vld [vmem:[#allocation38_spill] sm:$0xff]  ;;  %v4353_v1 = vld [vmem:[#allocation56_spill] sm:$0xff] }
 0x1b3   : > { %922 = vrot.lane.b32.xlu0 %v4344_v62, %s2254_s24  ;;  %v1418_v62 = vsel %vm1397_vm7, %v1385_v52, %v909_v4  ;;  %v1370_v4 = vsel %vm1364_vm6, %v3231_v42, %v3405_v25  ;;  %v1386_v42 = vsel %vm1364_vm6, %v3319_v59, %v3642_v2  ;;  %v4354_v59 = vld [vmem:[#allocation67_spill] sm:$0xff]  ;;  %v4355_v2 = vld [vmem:[#allocation68_spill] sm:$0xff] }
 0x1b4   : > { %v879_v17 = vpop.permute.xlu1 %878 }
 0x1b5   : > { %v1208_v57 = vpop.permute.xlu0 %1207  ;;  %v1403_v34 = vsel %vm1397_vm7, %v1370_v4, %v879_v17 }
 0x1b6   : > { %v1516_v15 = vsel %vm1496_vm10, %v1483_v28, %v1208_v57  ;;  %988 = vrot.lane.b32.xlu1 %v2223_v6, %s2255_s25 }
 0x1b7   : > { %1018 = vrot.lane.b32.xlu0 %v2224_v8, %s2255_s25  ;;  %2143 = vmatmul.mubr.msk.f32.gmra.mxu1 %vm1541_vm11, %v1516_v15 }
 0x1b8   : > { %v975_v9 = vpop.permute.xlu1 %974 }
 0x1b9   : > { %v911_v14 = vpop.permute.xlu0 %910  ;;  %v1435_v53 = vsel %vm1430_vm8, %v1402_v47, %v975_v9 }
 0x1ba   : > { %1088 = vrot.lane.b32.xlu1 %v4346_v5, %s2256_s30  ;;  %v1419_v25 = vsel %vm1397_vm7, %v1386_v42, %v911_v14 }
 0x1bb   : > { %1020 = vrot.lane.b32.xlu0 %v2225_v36, %s2255_s25 }
 0x1bc   : > { %v977_v38 = vpop.permute.xlu1 %976 }
 0x1bd   : > { %v1007_v33 = vpop.permute.xlu0 %1006  ;;  %v1436_v41 = vsel %vm1430_vm8, %v1403_v34, %v977_v38  ;;  %v762_v38 = vrot.slane %v4355_v2, 1 }
 0x1be   : > { %823 = vrot.lane.b32.xlu1 %v4347_v16, %s2253_s23  ;;  %v1451_v11 = vsel %vm1430_vm8, %v1418_v62, %v1007_v33  ;;  %v257_v33 = vld [vmem:[%s2302_s19 + $0x190] sm:$0x3]  ;;  %v4357_v62 = vld [vmem:[#allocation41_spill] sm:$0xff] }
 0x1bf   : > { %1120 = vrot.lane.b32.xlu0 %v4347_v16, %s2256_s30 }
 0x1c0   : > { %v1077_v29 = vpop.permute.xlu1 %1076 }
 0x1c1   : > { %v1009_v30 = vpop.permute.xlu0 %1008  ;;  %v1468_v45 = vsel %vm1463_vm9, %v1435_v53, %v1077_v29  ;;  %v765_v29 = vrot.slane %v257_v33, 1 }
 0x1c2   : > { %1122 = vrot.lane.b32.xlu1 %v4348_v22, %s2256_s30  ;;  %v1452_v17 = vsel %vm1430_vm8, %v1419_v25, %v1009_v30 }
 0x1c3   : > { %1090 = vrot.lane.b32.xlu0 %v4349_v55, %s2256_s30  ;;  %v864_v55 = vrot.slane %v4354_v59, 2 }
 0x1c4   : > { %v3691_v37 = vpop.permute.xlu1 %811 }
 0x1c5   : > { %v1109_v43 = vpop.permute.xlu0 %1108 }
 0x1c6   : > { %1221 = vrot.lane.b32.xlu1 %v4350_v50, %s2257_s10  ;;  %v1484_v35 = vsel %vm1463_vm9, %v1451_v11, %v1109_v43  ;;  %v863_v43 = vrot.slane %v4355_v2, 2  ;;  %v1387_v11 = vsel %vm1364_vm6, %v3335_v12, %v3691_v37 }
 0x1c7   : > { %1189 = vrot.lane.b32.xlu0 %v4351_v51, %s2257_s10 }
 0x1c8   : > { %v1111_v61 = vpop.permute.xlu1 %1110  ;;  %v865_v52 = vsel %vm486_vm1, %v863_v43, %v864_v55 }
 0x1c9   : > { %v1079_v44 = vpop.permute.xlu0 %1078  ;;  %v1485_v9 = vsel %vm1463_vm9, %v1452_v17, %v1111_v61  ;;  %v4356_v61 = vld [vmem:[#allocation11_spill] sm:$0xff] }
 0x1ca   : > { %892 = vrot.lane.b32.xlu1 %v4351_v51, %s2254_s24  ;;  %v1469_v28 = vsel %vm1463_vm9, %v1436_v41, %v1079_v44  ;;  %v1372_v41 = vsel %vm1364_vm6, %v3243_v31, %v3413_v20 }
 0x1cb   : > { %825 = vrot.lane.b32.xlu0 %v4348_v22, %s2253_s23 }
 0x1cc   : > { %v1210_v56 = vpop.permute.xlu1 %1209 }
 0x1cd   : > { %v1517_v19 = vsel %vm1496_vm10, %v1484_v35, %v1210_v56  ;;  %v1178_v0 = vpop.permute.xlu0 %1177  ;;  %v1371_v35 = vsel %vm1364_vm6, %v3247_v49, %v3415_v10 }
 0x1ce   : > { %v1501_v24 = vsel %vm1496_vm10, %v1468_v45, %v1178_v0  ;;  %1191 = vrot.lane.b32.xlu1 %v4352_v60, %s2257_s10  ;;  %2145 = vmatprep.mubr.msk.f32.mxu1 %vm1541_vm11, %v1517_v19  ;;  %v866_v0 = vrot.slane %v257_v33, 2 }
 0x1cf   : > { %924 = vrot.lane.b32.xlu0 %v4350_v50, %s2254_s24  ;;  %2121 = vmatprep.mubr.msk.f32.mxu0 %vm1541_vm11, %v1501_v24 }
 0x1d0   : > { %v881_v54 = vpop.permute.xlu1 %880 }
 0x1d1   : > { %v3724_v13 = vpop.permute.xlu0 %813  ;;  %v1404_v45 = vsel %vm1397_vm7, %v1371_v35, %v881_v54  ;;  %v867_v54 = vsel %vm486_vm1, %v864_v55, %v866_v0  ;;  %v4359_v55 = vld [vmem:[#allocation14_spill] sm:$0xff] }
 0x1d2   : > { %894 = vrot.lane.b32.xlu1 %v4352_v60, %s2254_s24  ;;  %v1388_v31 = vsel %vm1364_vm6, %v3331_v58, %v3724_v13 }
 0x1d3   : > { %1223 = vrot.lane.b32.xlu0 %v4353_v1, %s2257_s10 }
 0x1d4   : > { %v1180_v57 = vpop.permute.xlu1 %1179 }
 0x1d5   : > { %v1502_v15 = vsel %vm1496_vm10, %v1469_v28, %v1180_v57  ;;  %v913_v6 = vpop.permute.xlu0 %912 }
 0x1d6   : > { %990 = vrot.lane.b32.xlu1 %v3482_v32, %s2255_s25  ;;  %2122 = vmatmul.mubr.msk.f32.gmra.mxu0 %vm1541_vm11, %v1502_v15  ;;  %v763_v32 = vrot.slane %v4354_v59, 1  ;;  %v1420_v56 = vsel %vm1397_vm7, %v1387_v11, %v913_v6  ;;  %v4358_v15 = vld [vmem:[#allocation40_spill] sm:$0xff] }
 0x1d7   : > { %926 = vrot.lane.b32.xlu0 %v4353_v1, %s2254_s24 }
 0x1d8   : > { %v883_v8 = vpop.permute.xlu1 %882  ;;  %v766_v50 = vsel %vm309_vm0, %v763_v32, %v765_v29 }
 0x1d9   : > { %v1212_v5 = vpop.permute.xlu0 %1211  ;;  %v1405_v28 = vsel %vm1397_vm7, %v1372_v41, %v883_v8  ;;  %v258_v8 = vld [vmem:[%s2302_s19 + $0x198] sm:$0xff] }
 0x1da   : > { %v1518_v36 = vsel %vm1496_vm10, %v1485_v9, %v1212_v5  ;;  %992 = vrot.lane.b32.xlu1 %v3541_v27, %s2255_s25  ;;  %v764_v27 = vsel %vm309_vm0, %v762_v38, %v763_v32  ;;  %v1063_v13 = vrot.slane %v258_v8, 1 }
 0x1db   : > { %1022 = vrot.lane.b32.xlu0 %v4355_v2, %s2255_s25  ;;  %2146 = vmatmul.mubr.msk.f32.gmra.mxu1 %vm1541_vm11, %v1518_v36  ;;  %v259_v36 = vld [vmem:[%s2302_s19 + $0x1a0] sm:$0xff] }
 0x1dc   : > { %v979_v14 = vpop.permute.xlu1 %978  ;;  %v1064_v2 = vrot.slane %v259_v36, 1 }
 0x1dd   : > { %v915_v16 = vpop.permute.xlu0 %914  ;;  %v1437_v24 = vsel %vm1430_vm8, %v1404_v45, %v979_v14  ;;  %v260_v14 = vld [vmem:[%s2302_s19 + $0x1a8] sm:$0x3] }
 0x1de   : > { %1092 = vrot.lane.b32.xlu1 %v4280_v63, %s2256_s30  ;;  %v1421_v20 = vsel %vm1397_vm7, %v1388_v31, %v915_v16  ;;  %v1065_v16 = vsel %vm309_vm0, %v1063_v13, %v1064_v2  ;;  %v4363_v13 = vld [vmem:[#allocation42_spill] sm:$0xff] }
 0x1df   : > { %1024 = vrot.lane.b32.xlu0 %v4354_v59, %s2255_s25 }
 0x1e0   : > { %v981_v30 = vpop.permute.xlu1 %980 }
 0x1e1   : > { %v1011_v22 = vpop.permute.xlu0 %1010  ;;  %v1438_v57 = vsel %vm1430_vm8, %v1405_v28, %v981_v30 }
 0x1e2   : > { %827 = vrot.lane.b32.xlu1 %v764_v27, %s2253_s23  ;;  %v1453_v19 = vsel %vm1430_vm8, %v1420_v56, %v1011_v22  ;;  %v1164_v22 = vrot.slane %v258_v8, 2 }
 0x1e3   : > { %1124 = vrot.lane.b32.xlu0 %v764_v27, %s2256_s30  ;;  %v1066_v27 = vrot.slane %v260_v14, 1 }
 0x1e4   : > { %v1081_v51 = vpop.permute.xlu1 %1080 }
 0x1e5   : > { %v1013_v63 = vpop.permute.xlu0 %1012  ;;  %v1470_v60 = vsel %vm1463_vm9, %v1437_v24, %v1081_v51  ;;  %v1067_v43 = vsel %vm309_vm0, %v1064_v2, %v1066_v27  ;;  %v4360_v24 = vld [vmem:[#allocation3_spill] sm:$0xff]  ;;  %v4364_v2 = vld [vmem:[#allocation5_spill] sm:$0xff] }
 0x1e6   : > { %1126 = vrot.lane.b32.xlu1 %v766_v50, %s2256_s30  ;;  %v1454_v9 = vsel %vm1430_vm8, %v1421_v20, %v1013_v63  ;;  %v1167_v63 = vrot.slane %v260_v14, 2 }
 0x1e7   : > { %1094 = vrot.lane.b32.xlu0 %v4356_v61, %s2256_s30 }
 0x1e8   : > { %v3768_v44 = vpop.permute.xlu1 %815 }
 0x1e9   : > { %v1113_v3 = vpop.permute.xlu0 %1112 }
 0x1ea   : > { %1225 = vrot.lane.b32.xlu1 %v865_v52, %s2257_s10  ;;  %v1486_v12 = vsel %vm1463_vm9, %v1453_v19, %v1113_v3 }
 0x1eb   : > { %1193 = vrot.lane.b32.xlu0 %v4357_v62, %s2257_s10 }
 0x1ec   : > { %v1115_v47 = vpop.permute.xlu1 %1114 }
 0x1ed   : > { %v1083_v53 = vpop.permute.xlu0 %1082  ;;  %v1487_v59 = vsel %vm1463_vm9, %v1454_v9, %v1115_v47  ;;  %v1389_v47 = vsel %vm1364_vm6, %v3347_v46, %v3768_v44 }
 0x1ee   : > { %829 = vrot.lane.b32.xlu1 %v766_v50, %s2253_s23  ;;  %v1471_v6 = vsel %vm1463_vm9, %v1438_v57, %v1083_v53 }
 0x1ef   : > { %797 = vrot.lane.b32.xlu0 %v4356_v61, %s2253_s23 }
 0x1f0   : > { %v1214_v37 = vpop.permute.xlu1 %1213 }
 0x1f1   : > { %v1519_v49 = vsel %vm1496_vm10, %v1486_v12, %v1214_v37  ;;  %v1182_v10 = vpop.permute.xlu0 %1181 }
 0x1f2   : > { %v1503_v4 = vsel %vm1496_vm10, %v1470_v60, %v1182_v10  ;;  %928 = vrot.lane.b32.xlu1 %v865_v52, %s2254_s24  ;;  %2148 = vmatprep.mubr.msk.f32.mxu1 %vm1541_vm11, %v1519_v49 }
 0x1f3   : > { %896 = vrot.lane.b32.xlu0 %v4357_v62, %s2254_s24  ;;  %2124 = vmatprep.mubr.msk.f32.mxu0 %vm1541_vm11, %v1503_v4 }
 0x1f4   : > { %v885_v34 = vpop.permute.xlu1 %884 }
 0x1f5   : > { %v3799_v1 = vpop.permute.xlu0 %817 }
 0x1f6   : > { %1227 = vrot.lane.b32.xlu1 %v867_v54, %s2257_s10 }
 0x1f7   : > { %1195 = vrot.lane.b32.xlu0 %v4358_v15, %s2257_s10 }
 0x1f8   : > { %v1184_v42 = vpop.permute.xlu1 %1183 }
 0x1f9   : > { %v1504_v25 = vsel %vm1496_vm10, %v1471_v6, %v1184_v42  ;;  %v917_v17 = vpop.permute.xlu0 %916 }
 0x1fa   : > { %930 = vrot.lane.b32.xlu1 %v867_v54, %s2254_s24  ;;  %2125 = vmatmul.mubr.msk.f32.gmra.mxu0 %vm1541_vm11, %v1504_v25  ;;  %v1422_v53 = vsel %vm1397_vm7, %v1389_v47, %v917_v17 }
 0x1fb   : > { %898 = vrot.lane.b32.xlu0 %v4358_v15, %s2254_s24 }
 0x1fc   : > { %v887_v5 = vpop.permute.xlu1 %886 }
 0x1fd   : > { %v1216_v32 = vpop.permute.xlu0 %1215 }
 0x1fe   : > { %v1520_v58 = vsel %vm1496_vm10, %v1487_v59, %v1216_v32  ;;  %1026 = vrot.lane.b32.xlu1 %v258_v8, %s2255_s25  ;;  %v4362_v59 = vld [vmem:[#allocation23_spill] sm:$0xff] }
 0x1ff   : > { %994 = vrot.lane.b32.xlu0 %v3590_v40, %s2255_s25  ;;  %2149 = vmatmul.mubr.msk.f32.gmra.mxu1 %vm1541_vm11, %v1520_v58  ;;  %v1165_v40 = vrot.slane %v259_v36, 2 }
 0x200   : > { %v983_v38 = vpop.permute.xlu1 %982 }
 0x201   : > { %v919_v33 = vpop.permute.xlu0 %918  ;;  %v1168_v3 = vsel %vm486_vm1, %v1165_v40, %v1167_v63 }
 0x202   : > { %1028 = vrot.lane.b32.xlu1 %v259_v36, %s2255_s25 }
 0x203   : > { %996 = vrot.lane.b32.xlu0 %v3648_v39, %s2255_s25  ;;  %v1166_v39 = vsel %vm486_vm1, %v1164_v22, %v1165_v40 }
 0x204   : > { %v985_v29 = vpop.permute.xlu1 %984 }
 0x205   : > { %v1015_v30 = vpop.permute.xlu0 %1014 }
 0x206   : > { %1128 = vrot.lane.b32.xlu1 %v1065_v16, %s2256_s30 }
 0x207   : > { %1096 = vrot.lane.b32.xlu0 %v4359_v55, %s2256_s30 }
 0x208   : > { %v1085_v50 = vpop.permute.xlu1 %1084 }
 0x209   : > { %v1017_v51 = vpop.permute.xlu0 %1016 }
 0x20a   : > { %1130 = vrot.lane.b32.xlu1 %v1067_v43, %s2256_s30 }
 0x20b   : > { %1098 = vrot.lane.b32.xlu0 %v4281_v48, %s2256_s30  ;;  %v1373_v48 = vsel %vm1364_vm6, %v3259_v23, %v3423_v21 }
 0x20c   : > { %v820_v61 = vpop.permute.xlu1 %819  ;;  %v1406_v35 = vsel %vm1397_vm7, %v1373_v48, %v885_v34  ;;  %v4361_v34 = vld [vmem:[#allocation13_spill] sm:$0xff] }
 0x20d   : > { %v1117_v52 = vpop.permute.xlu0 %1116  ;;  %v1439_v56 = vsel %vm1430_vm8, %v1406_v35, %v983_v38  ;;  %v1390_v41 = vsel %vm1364_vm6, %v4361_v34, %v3799_v1  ;;  %v1391_v32 = vsel %vm1364_vm6, %v4362_v59, %v820_v61  ;;  %v1375_v38 = vsel %vm1364_vm6, %v4364_v2, %v4363_v13 }
 0x20e   : > { %1229 = vrot.lane.b32.xlu1 %v1166_v39, %s2257_s10  ;;  %v1472_v45 = vsel %vm1463_vm9, %v1439_v56, %v1085_v50  ;;  %v1423_v28 = vsel %vm1397_vm7, %v1390_v41, %v919_v33  ;;  %v4366_v39 = vld [vmem:[#allocation4_spill] sm:$0xff] }
 0x20f   : > { %1197 = vrot.lane.b32.xlu0 %v2770_v18, %s2257_s10  ;;  %v1455_v18 = vsel %vm1430_vm8, %v1422_v53, %v1015_v30  ;;  %v4367_v53 = vld [vmem:[#allocation62_spill] sm:$0xff] }
 0x210   : > { %v1119_v62 = vpop.permute.xlu1 %1118  ;;  %v1488_v46 = vsel %vm1463_vm9, %v1455_v18, %v1117_v52 }
 0x211   : > { %v1087_v11 = vpop.permute.xlu0 %1086 }
 0x212   : > { %1231 = vrot.lane.b32.xlu1 %v1168_v3, %s2257_s10 }
 0x213   : > { %1199 = vrot.lane.b32.xlu0 %v2765_v7, %s2257_s10  ;;  %v1374_v7 = vsel %vm1364_vm6, %v4360_v24, %v3421_v26  ;;  %v1456_v26 = vsel %vm1430_vm8, %v1423_v28, %v1017_v51  ;;  %v4365_v51 = vld [vmem:[#allocation28_spill] sm:$0xff]  ;;  %v3914_v24 = vld [vmem:[%s4093_s2] ss:$0 sm:$0xff] }
 0x214   : > { %v1218_v44 = vpop.permute.xlu1 %1217  ;;  %v1407_v37 = vsel %vm1397_vm7, %v1374_v7, %v887_v5  ;;  %v1489_v15 = vsel %vm1463_vm9, %v1456_v26, %v1119_v62  ;;  %v1376_v63 = vsel %vm1364_vm6, %v4366_v39, %v4365_v51 }
 0x215   : > { %v1521_v23 = vsel %vm1496_vm10, %v1488_v46, %v1218_v44  ;;  %v1186_v21 = vpop.permute.xlu0 %1185  ;;  %v1440_v60 = vsel %vm1430_vm8, %v1407_v37, %v985_v29 }
 0x216   : > { %v1505_v19 = vsel %vm1496_vm10, %v1472_v45, %v1186_v21  ;;  %2151 = vmatprep.mubr.msk.f32.mxu1 %vm1541_vm11, %v1521_v23  ;;  %v1473_v49 = vsel %vm1463_vm9, %v1440_v60, %v1087_v11 }
 0x217   : > { %2127 = vmatprep.mubr.msk.f32.mxu0 %vm1541_vm11, %v1505_v19 }
 0x218   : > { %v889_v0 = vpop.permute.xlu1 %888 }
 0x219   : > { %v822_v12 = vpop.permute.xlu0 %821  ;;  %v1408_v33 = vsel %vm1397_vm7, %v1375_v38, %v889_v0 }
 0x21a   : > { %v1392_v35 = vsel %vm1364_vm6, %v4367_v53, %v822_v12 }
 0x21c   : > { %v1188_v10 = vpop.permute.xlu1 %1187 }
 0x21d   : > { %v1506_v4 = vsel %vm1496_vm10, %v1473_v49, %v1188_v10  ;;  %v921_v54 = vpop.permute.xlu0 %920 }
 0x21e   : > { %2128 = vmatmul.mubr.msk.f32.gmra.mxu0 %vm1541_vm11, %v1506_v4  ;;  %v1424_v14 = vsel %vm1397_vm7, %v1391_v32, %v921_v54 }
 0x220   : > { %v891_v57 = vpop.permute.xlu1 %890 }
 0x221   : > { %v1220_v6 = vpop.permute.xlu0 %1219  ;;  %v1409_v52 = vsel %vm1397_vm7, %v1376_v63, %v891_v57 }
 0x222   : > { %v1522_v42 = vsel %vm1496_vm10, %v1489_v15, %v1220_v6 }
 0x223   : > { %2152 = vmatmul.mubr.msk.f32.gmra.mxu1 %vm1541_vm11, %v1522_v42 }
 0x224   : > { %v987_v25 = vpop.permute.xlu1 %986 }
 0x225   : > { %v923_v17 = vpop.permute.xlu0 %922  ;;  %v1441_v27 = vsel %vm1430_vm8, %v1408_v33, %v987_v25 }
 0x226   : > { %v1425_v18 = vsel %vm1397_vm7, %v1392_v35, %v923_v17 }
 0x228   : > { %v989_v31 = vpop.permute.xlu1 %988 }
 0x229   : > { %v1019_v20 = vpop.permute.xlu0 %1018  ;;  %v1442_v3 = vsel %vm1430_vm8, %v1409_v52, %v989_v31  ;;  %v4368_v31 = vld [vmem:[#allocation15_spill] sm:$0xff] }
 0x22a   : > { %v1457_v16 = vsel %vm1430_vm8, %v1424_v14, %v1019_v20 }
 0x22c   : > { %v1089_v8 = vpop.permute.xlu1 %1088 }
 0x22d   : > { %v1021_v1 = vpop.permute.xlu0 %1020  ;;  %v1474_v22 = vsel %vm1463_vm9, %v1441_v27, %v1089_v8 }
 0x22e   : > { %v1458_v56 = vsel %vm1430_vm8, %v1425_v18, %v1021_v1  ;;  %v4369_v1 = vld [vmem:[#allocation17_spill] sm:$0xff] }
 0x230   : > { %v3877_v9 = vpop.permute.xlu1 %823 }
 0x231   : > { %v1121_v5 = vpop.permute.xlu0 %1120  ;;  %v1393_v20 = vsel %vm1364_vm6, %v4368_v31, %v3877_v9 }
 0x232   : > { %v1490_v29 = vsel %vm1463_vm9, %v1457_v16, %v1121_v5  ;;  %v4370_v5 = vld [vmem:[#allocation7_spill] sm:$0xff] }
 0x234   : > { %v1123_v36 = vpop.permute.xlu1 %1122 }
 0x235   : > { %v1091_v58 = vpop.permute.xlu0 %1090  ;;  %v1491_v44 = vsel %vm1463_vm9, %v1458_v56, %v1123_v36  ;;  %v1377_v36 = vsel %vm1364_vm6, %v4370_v5, %v4369_v1 }
 0x236   : > { %v1475_v62 = vsel %vm1463_vm9, %v1442_v3, %v1091_v58 }
 0x238   : > { %v1222_v30 = vpop.permute.xlu1 %1221 }
 0x239   : > { %v1523_v40 = vsel %vm1496_vm10, %v1490_v29, %v1222_v30  ;;  %v1190_v55 = vpop.permute.xlu0 %1189 }
 0x23a   : > { %v1507_v43 = vsel %vm1496_vm10, %v1474_v22, %v1190_v55  ;;  %2154 = vmatprep.mubr.msk.f32.mxu1 %vm1541_vm11, %v1523_v40  ;;  %v4371_v22 = vld [vmem:[#allocation16_spill] sm:$0xff] }
 0x23b   : > { %2130 = vmatprep.mubr.msk.f32.mxu0 %vm1541_vm11, %v1507_v43  ;;  %v4372_v43 = vld [vmem:[#allocation18_spill] sm:$0xff] }
 0x23c   : > { %v893_v50 = vpop.permute.xlu1 %892 }
 0x23d   : > { %v3897_v61 = vpop.permute.xlu0 %825  ;;  %v1410_v32 = vsel %vm1397_vm7, %v1377_v36, %v893_v50  ;;  %v4373_v50 = vld [vmem:[#allocation6_spill] sm:$0xff] }
 0x23e   : > { %v1394_v40 = vsel %vm1364_vm6, %v4371_v22, %v3897_v61  ;;  %v1378_v51 = vsel %vm1364_vm6, %v4373_v50, %v4372_v43 }
 0x240   : > { %v1192_v47 = vpop.permute.xlu1 %1191 }
 0x241   : > { %v1508_v11 = vsel %vm1496_vm10, %v1475_v62, %v1192_v47  ;;  %v925_v48 = vpop.permute.xlu0 %924 }
 0x242   : > { %2131 = vmatmul.mubr.msk.f32.gmra.mxu0 %vm1541_vm11, %v1508_v11  ;;  %v1426_v59 = vsel %vm1397_vm7, %v1393_v20, %v925_v48 }
 0x244   : > { %v895_v46 = vpop.permute.xlu1 %894 }
 0x245   : > { %v1224_v45 = vpop.permute.xlu0 %1223  ;;  %v1411_v63 = vsel %vm1397_vm7, %v1378_v51, %v895_v46 }
 0x246   : > { %v1524_v23 = vsel %vm1496_vm10, %v1491_v44, %v1224_v45 }
 0x247   : > { %2155 = vmatmul.mubr.msk.f32.gmra.mxu1 %vm1541_vm11, %v1524_v23 }
 0x248   : > { %v991_v21 = vpop.permute.xlu1 %990 }
 0x249   : > { %v927_v19 = vpop.permute.xlu0 %926  ;;  %v1443_v13 = vsel %vm1430_vm8, %v1410_v32, %v991_v21 }
 0x24a   : > { %v1427_v39 = vsel %vm1397_vm7, %v1394_v40, %v927_v19 }
 0x24c   : > { %v993_v0 = vpop.permute.xlu1 %992 }
 0x24d   : > { %v1023_v7 = vpop.permute.xlu0 %1022  ;;  %v1444_v3 = vsel %vm1430_vm8, %v1411_v63, %v993_v0 }
 0x24e   : > { %v2117_v12 = vpop.f32.mrf.mxu0  ;;  %v1459_v58 = vsel %vm1430_vm8, %v1426_v59, %v1023_v7  ;;  %v4377_v59 = vld [vmem:[#allocation43_spill] sm:$0xff] }
 0x24f   : > { %v1714_v37 = vadd.f32 %v2117_v12, %v3914_v24 }
 0x250   : > { %v1093_v60 = vpop.permute.xlu1 %1092  ;;  %v1708_v49 = vpop.f32.mrf.mxu0 }
 0x251   : > { %v1868_v10 = vmax.f32 %v1714_v37, 0.0  ;;  %v1709_v4 = vadd.f32 %v3914_v24, %v1708_v49  ;;  %v1025_v54 = vpop.permute.xlu0 %1024  ;;  %v1476_v9 = vsel %vm1463_vm9, %v1443_v13, %v1093_v60 }
 0x252   : > { %v1460_v52 = vsel %vm1430_vm8, %v1427_v39, %v1025_v54 }
 0x253   : > { %1900 = vst.msk [vmem:[%s3921_s20 + $0x8] sm:$0xff] %vm1496_vm10, %v1868_v10  ;;  %v1867_v34 = vmax.f32 %v1709_v4, 0.0  ;;  %v2141_v41 = vpop.f32.mrf.mxu1 }
 0x254   : > { %v1794_v28 = vadd.f32 %v2141_v41, %v3914_v24  ;;  %v3927_v26 = vpop.permute.xlu1 %827 }
 0x255   : > { %1899 = vst.msk [vmem:[%s3921_s20] sm:$0xff] %vm1496_vm10, %v1867_v34  ;;  %v1788_v57 = vpop.f32.mrf.mxu1  ;;  %v1125_v15 = vpop.permute.xlu0 %1124 }
 0x256   : > { %v1884_v6 = vmax.f32 %v1794_v28, 0.0  ;;  %v1789_v42 = vadd.f32 %v3914_v24, %v1788_v57  ;;  %v1492_v2 = vsel %vm1463_vm9, %v1459_v58, %v1125_v15  ;;  %v4374_v57 = vld [vmem:[#allocation29_spill] sm:$0xff] }
 0x257   : > { %v1395_v15 = vsel %vm1364_vm6, %v4374_v57, %v3927_v26 }
 0x258   : > { %1916 = vst.msk [vmem:[%s3921_s20 + $0x88] sm:$0xff] %vm1496_vm10, %v1884_v6  ;;  %v1883_v25 = vmax.f32 %v1789_v42, 0.0  ;;  %v1127_v17 = vpop.permute.xlu1 %1126  ;;  %v4375_v42 = vld [vmem:[#allocation45_spill] sm:$0xff] }
 0x259   : > { %v1095_v8 = vpop.permute.xlu0 %1094  ;;  %v1493_v62 = vsel %vm1463_vm9, %v1460_v52, %v1127_v17 }
 0x25a   : > { %1915 = vst.msk [vmem:[%s3921_s20 + $0x80] sm:$0xff] %vm1496_vm10, %v1883_v25  ;;  %v1477_v11 = vsel %vm1463_vm9, %v1444_v3, %v1095_v8  ;;  %v4376_v25 = vld [vmem:[#allocation12_spill] sm:$0xff] }
 0x25b   : > { %v1379_v17 = vsel %vm1364_vm6, %v4376_v25, %v4375_v42 }
 0x25c   : > { %v1226_v38 = vpop.permute.xlu1 %1225 }
 0x25d   : > { %v1525_v14 = vsel %vm1496_vm10, %v1492_v2, %v1226_v38  ;;  %v1194_v33 = vpop.permute.xlu0 %1193  ;;  %v4378_v2 = vld [vmem:[#allocation8_spill] sm:$0xff] }
 0x25e   : > { %v1509_v16 = vsel %vm1496_vm10, %v1476_v9, %v1194_v33  ;;  %2157 = vmatprep.mubr.msk.f32.mxu1 %vm1541_vm11, %v1525_v14 }
 0x25f   : > { %2133 = vmatprep.mubr.msk.f32.mxu0 %vm1541_vm11, %v1509_v16 }
 0x260   : > { %v830_v27 = vpop.permute.xlu1 %829 }
 0x261   : > { %v798_v29 = vpop.permute.xlu0 %797  ;;  %v1396_v26 = vsel %vm1364_vm6, %v4377_v59, %v830_v27 }
 0x262   : > { %v1380_v38 = vsel %vm1364_vm6, %v4378_v2, %v798_v29 }
 0x264   : > { %v929_v30 = vpop.permute.xlu1 %928 }
 0x265   : > { %v897_v55 = vpop.permute.xlu0 %896  ;;  %v1428_v31 = vsel %vm1397_vm7, %v1395_v15, %v929_v30 }
 0x266   : > { %v1412_v20 = vsel %vm1397_vm7, %v1379_v17, %v897_v55 }
 0x268   : > { %v1228_v47 = vpop.permute.xlu1 %1227 }
 0x269   : > { %v1526_v61 = vsel %vm1496_vm10, %v1493_v62, %v1228_v47  ;;  %v1196_v48 = vpop.permute.xlu0 %1195 }
 0x26a   : > { %v1510_v53 = vsel %vm1496_vm10, %v1477_v11, %v1196_v48  ;;  %2158 = vmatmul.mubr.msk.f32.gmra.mxu1 %vm1541_vm11, %v1526_v61 }
 0x26b   : > { %2134 = vmatmul.mubr.msk.f32.gmra.mxu0 %vm1541_vm11, %v1510_v53 }
 0x26c   : > { %v931_v35 = vpop.permute.xlu1 %930 }
 0x26d   : > { %v899_v18 = vpop.permute.xlu0 %898  ;;  %v1429_v9 = vsel %vm1397_vm7, %v1396_v26, %v931_v35 }
 0x26e   : > { %v1413_v33 = vsel %vm1397_vm7, %v1380_v38, %v899_v18 }
 0x270   : > { %v1027_v56 = vpop.permute.xlu1 %1026 }
 0x271   : > { %v995_v46 = vpop.permute.xlu0 %994  ;;  %v1461_v8 = vsel %vm1430_vm8, %v1428_v31, %v1027_v56 }
 0x272   : > { %v2120_v44 = vpop.f32.mrf.mxu0  ;;  %v1445_v1 = vsel %vm1430_vm8, %v1412_v20, %v995_v46 }
 0x273   : > { %v1724_v45 = vadd.f32 %v2120_v44, %v3914_v24 }
 0x274   : > { %v1029_v23 = vpop.permute.xlu1 %1028  ;;  %v1718_v21 = vpop.f32.mrf.mxu0 }
 0x275   : > { %v1870_v19 = vmax.f32 %v1724_v45, 0.0  ;;  %v1719_v0 = vadd.f32 %v3914_v24, %v1718_v21  ;;  %v997_v7 = vpop.permute.xlu0 %996  ;;  %v1462_v16 = vsel %vm1430_vm8, %v1429_v9, %v1029_v23 }
 0x276   : > { %v1446_v27 = vsel %vm1430_vm8, %v1413_v33, %v997_v7 }
 0x277   : > { %1902 = vst.msk [vmem:[%s3921_s20 + $0x18] sm:$0xff] %vm1496_vm10, %v1870_v19  ;;  %v1869_v12 = vmax.f32 %v1719_v0, 0.0  ;;  %v2144_v37 = vpop.f32.mrf.mxu1 }
 0x278   : > { %v1804_v60 = vadd.f32 %v2144_v37, %v3914_v24  ;;  %v1129_v49 = vpop.permute.xlu1 %1128 }
 0x279   : > { %1901 = vst.msk [vmem:[%s3921_s20 + $0x10] sm:$0xff] %vm1496_vm10, %v1869_v12  ;;  %v1798_v10 = vpop.f32.mrf.mxu1  ;;  %v1097_v4 = vpop.permute.xlu0 %1096  ;;  %v1494_v5 = vsel %vm1463_vm9, %v1461_v8, %v1129_v49 }
 0x27a   : > { %v1886_v54 = vmax.f32 %v1804_v60, 0.0  ;;  %v1799_v34 = vadd.f32 %v3914_v24, %v1798_v10  ;;  %v1478_v32 = vsel %vm1463_vm9, %v1445_v1, %v1097_v4 }
 0x27c   : > { %1918 = vst.msk [vmem:[%s3921_s20 + $0x98] sm:$0xff] %vm1496_vm10, %v1886_v54  ;;  %v1885_v41 = vmax.f32 %v1799_v34, 0.0  ;;  %v1131_v28 = vpop.permute.xlu1 %1130 }
 0x27d   : > { %v1099_v6 = vpop.permute.xlu0 %1098  ;;  %v1495_v30 = vsel %vm1463_vm9, %v1462_v16, %v1131_v28 }
 0x27e   : > { %1917 = vst.msk [vmem:[%s3921_s20 + $0x90] sm:$0xff] %vm1496_vm10, %v1885_v41  ;;  %v1479_v29 = vsel %vm1463_vm9, %v1446_v27, %v1099_v6 }
 0x280   : > { %v1230_v36 = vpop.permute.xlu1 %1229 }
 0x281   : > { %v1527_v58 = vsel %vm1496_vm10, %v1494_v5, %v1230_v36  ;;  %v1198_v13 = vpop.permute.xlu0 %1197 }
 0x282   : > { %v1511_v14 = vsel %vm1496_vm10, %v1478_v32, %v1198_v13  ;;  %2160 = vmatprep.mubr.msk.f32.mxu1 %vm1541_vm11, %v1527_v58 }
 0x283   : > { %2136 = vmatprep.mubr.msk.f32.mxu0 %vm1541_vm11, %v1511_v14 }
 0x284   : > { %v1232_v22 = vpop.permute.xlu1 %1231 }
 0x285   : > { %v1528_v40 = vsel %vm1496_vm10, %v1495_v30, %v1232_v22  ;;  %v1200_v55 = vpop.permute.xlu0 %1199 }
 0x286   : > { %v1512_v43 = vsel %vm1496_vm10, %v1479_v29, %v1200_v55  ;;  %2161 = vmatmul.mubr.msk.f32.gmra.mxu1 %vm1541_vm11, %v1528_v40 }
 0x287   : > { %2137 = vmatmul.mubr.msk.f32.gmra.mxu0 %vm1541_vm11, %v1512_v43 }
 0x296   : > { %v2123_v50 = vpop.f32.mrf.mxu0 }
 0x297   : > { %v1734_v51 = vadd.f32 %v2123_v50, %v3914_v24 }
 0x298   : > { %v1728_v39 = vpop.f32.mrf.mxu0 }
 0x299   : > { %v1872_v63 = vmax.f32 %v1734_v51, 0.0  ;;  %v1729_v52 = vadd.f32 %v3914_v24, %v1728_v39 }
 0x29b   : > { %1904 = vst.msk [vmem:[%s3921_s20 + $0x28] sm:$0xff] %vm1496_vm10, %v1872_v63  ;;  %v1871_v3 = vmax.f32 %v1729_v52, 0.0  ;;  %v2147_v62 = vpop.f32.mrf.mxu1 }
 0x29c   : > { %v1814_v47 = vadd.f32 %v2147_v62, %v3914_v24 }
 0x29d   : > { %1903 = vst.msk [vmem:[%s3921_s20 + $0x20] sm:$0xff] %vm1496_vm10, %v1871_v3  ;;  %v1808_v11 = vpop.f32.mrf.mxu1 }
 0x29e   : > { %v1888_v61 = vmax.f32 %v1814_v47, 0.0  ;;  %v1809_v48 = vadd.f32 %v3914_v24, %v1808_v11 }
 0x2a0   : > { %1920 = vst.msk [vmem:[%s3921_s20 + $0xa8] sm:$0xff] %vm1496_vm10, %v1888_v61  ;;  %v1887_v53 = vmax.f32 %v1809_v48, 0.0 }
 0x2a2   : > { %1919 = vst.msk [vmem:[%s3921_s20 + $0xa0] sm:$0xff] %vm1496_vm10, %v1887_v53 }
 0x2ba   : > { %v2126_v35 = vpop.f32.mrf.mxu0 }
 0x2bb   : > { %v1744_v18 = vadd.f32 %v2126_v35, %v3914_v24 }
 0x2bc   : > { %v1738_v56 = vpop.f32.mrf.mxu0 }
 0x2bd   : > { %v1874_v46 = vmax.f32 %v1744_v18, 0.0  ;;  %v1739_v44 = vadd.f32 %v3914_v24, %v1738_v56 }
 0x2bf   : > { %1906 = vst.msk [vmem:[%s3921_s20 + $0x38] sm:$0xff] %vm1496_vm10, %v1874_v46  ;;  %v1873_v45 = vmax.f32 %v1739_v44, 0.0  ;;  %v2150_v23 = vpop.f32.mrf.mxu1 }
 0x2c0   : > { %v1824_v21 = vadd.f32 %v2150_v23, %v3914_v24 }
 0x2c1   : > { %1905 = vst.msk [vmem:[%s3921_s20 + $0x30] sm:$0xff] %vm1496_vm10, %v1873_v45  ;;  %v1818_v19 = vpop.f32.mrf.mxu1 }
 0x2c2   : > { %v1890_v0 = vmax.f32 %v1824_v21, 0.0  ;;  %v1819_v7 = vadd.f32 %v3914_v24, %v1818_v19 }
 0x2c4   : > { %1922 = vst.msk [vmem:[%s3921_s20 + $0xb8] sm:$0xff] %vm1496_vm10, %v1890_v0  ;;  %v1889_v12 = vmax.f32 %v1819_v7, 0.0 }
 0x2c6   : > { %1921 = vst.msk [vmem:[%s3921_s20 + $0xb0] sm:$0xff] %vm1496_vm10, %v1889_v12 }
 0x2de   : > { %v2129_v37 = vpop.f32.mrf.mxu0 }
 0x2df   : > { %v1754_v60 = vadd.f32 %v2129_v37, %v3914_v24 }
 0x2e0   : > { %v1748_v49 = vpop.f32.mrf.mxu0 }
 0x2e1   : > { %v1876_v10 = vmax.f32 %v1754_v60, 0.0  ;;  %v1749_v4 = vadd.f32 %v3914_v24, %v1748_v49 }
 0x2e3   : > { %1908 = vst.msk [vmem:[%s3921_s20 + $0x48] sm:$0xff] %vm1496_vm10, %v1876_v10  ;;  %v1875_v54 = vmax.f32 %v1749_v4, 0.0  ;;  %v2153_v34 = vpop.f32.mrf.mxu1 }
 0x2e4   : > { %v1834_v41 = vadd.f32 %v2153_v34, %v3914_v24 }
 0x2e5   : > { %1907 = vst.msk [vmem:[%s3921_s20 + $0x40] sm:$0xff] %vm1496_vm10, %v1875_v54  ;;  %v1828_v28 = vpop.f32.mrf.mxu1 }
 0x2e6   : > { %v1892_v57 = vmax.f32 %v1834_v41, 0.0  ;;  %v1829_v15 = vadd.f32 %v3914_v24, %v1828_v28 }
 0x2e8   : > { %1924 = vst.msk [vmem:[%s3921_s20 + $0xc8] sm:$0xff] %vm1496_vm10, %v1892_v57  ;;  %v1891_v6 = vmax.f32 %v1829_v15, 0.0 }
 0x2ea   : > { %1923 = vst.msk [vmem:[%s3921_s20 + $0xc0] sm:$0xff] %vm1496_vm10, %v1891_v6 }
 0x302   : > { %v2132_v42 = vpop.f32.mrf.mxu0 }
 0x303   : > { %v1764_v25 = vadd.f32 %v2132_v42, %v3914_v24 }
 0x304   : > { %v1758_v17 = vpop.f32.mrf.mxu0 }
 0x305   : > { %v1878_v31 = vmax.f32 %v1764_v25, 0.0  ;;  %v1759_v20 = vadd.f32 %v3914_v24, %v1758_v17 }
 0x307   : > { %1910 = vst.msk [vmem:[%s3921_s20 + $0x58] sm:$0xff] %vm1496_vm10, %v1878_v31  ;;  %v1877_v8 = vmax.f32 %v1759_v20, 0.0  ;;  %v2156_v1 = vpop.f32.mrf.mxu1 }
 0x308   : > { %v1844_v5 = vadd.f32 %v2156_v1, %v3914_v24 }
 0x309   : > { %1909 = vst.msk [vmem:[%s3921_s20 + $0x50] sm:$0xff] %vm1496_vm10, %v1877_v8  ;;  %v1838_v36 = vpop.f32.mrf.mxu1 }
 0x30a   : > { %v1894_v59 = vmax.f32 %v1844_v5, 0.0  ;;  %v1839_v26 = vadd.f32 %v3914_v24, %v1838_v36 }
 0x30c   : > { %1926 = vst.msk [vmem:[%s3921_s20 + $0xd8] sm:$0xff] %vm1496_vm10, %v1894_v59  ;;  %v1893_v32 = vmax.f32 %v1839_v26, 0.0 }
 0x30e   : > { %1925 = vst.msk [vmem:[%s3921_s20 + $0xd0] sm:$0xff] %vm1496_vm10, %v1893_v32 }
 0x32a   : > { %v2159_v58 = vpop.f32.mrf.mxu1 }
 0x32b   : > { %v2135_v13 = vpop.f32.mrf.mxu0  ;;  %v1854_v2 = vadd.f32 %v2159_v58, %v3914_v24 }
 0x32c   : > { %v1774_v38 = vadd.f32 %v2135_v13, %v3914_v24  ;;  %v1848_v9 = vpop.f32.mrf.mxu1 }
 0x32d   : > { %v1896_v14 = vmax.f32 %v1854_v2, 0.0  ;;  %v1768_v33 = vpop.f32.mrf.mxu0  ;;  %v1849_v16 = vadd.f32 %v3914_v24, %v1848_v9 }
 0x32e   : > { %v1880_v27 = vmax.f32 %v1774_v38, 0.0  ;;  %v1769_v30 = vadd.f32 %v3914_v24, %v1768_v33 }
 0x32f   : > { %1928 = vst.msk [vmem:[%s3921_s20 + $0xe8] sm:$0xff] %vm1496_vm10, %v1896_v14  ;;  %v1895_v22 = vmax.f32 %v1849_v16, 0.0 }
 0x330   : > { %1912 = vst.msk [vmem:[%s3921_s20 + $0x68] sm:$0xff] %vm1496_vm10, %v1880_v27  ;;  %v1879_v29 = vmax.f32 %v1769_v30, 0.0 }
 0x331   : > { %1927 = vst.msk [vmem:[%s3921_s20 + $0xe0] sm:$0xff] %vm1496_vm10, %v1895_v22 }
 0x332   : > { %1911 = vst.msk [vmem:[%s3921_s20 + $0x60] sm:$0xff] %vm1496_vm10, %v1879_v29 }
 0x346   : > { %v2162_v40 = vpop.f32.mrf.mxu1 }
 0x347   : > { %v2138_v55 = vpop.f32.mrf.mxu0  ;;  %v1864_v43 = vadd.f32 %v2162_v40, %v3914_v24 }
 0x348   : > { %v1784_v50 = vadd.f32 %v2138_v55, %v3914_v24  ;;  %v1858_v51 = vpop.f32.mrf.mxu1 }
 0x349   : > { %v1898_v39 = vmax.f32 %v1864_v43, 0.0  ;;  %v1778_v63 = vpop.f32.mrf.mxu0  ;;  %v1859_v52 = vadd.f32 %v3914_v24, %v1858_v51 }
 0x34a   : > { %v1882_v3 = vmax.f32 %v1784_v50, 0.0  ;;  %v1779_v62 = vadd.f32 %v3914_v24, %v1778_v63 }
 0x34b   : > { %1930 = vst.msk [vmem:[%s3921_s20 + $0xf8] sm:$0xff] %vm1496_vm10, %v1898_v39  ;;  %v1897_v47 = vmax.f32 %v1859_v52, 0.0 }
 0x34c   : > { %1914 = vst.msk [vmem:[%s3921_s20 + $0x78] sm:$0xff] %vm1496_vm10, %v1882_v3  ;;  %v1881_v11 = vmax.f32 %v1779_v62, 0.0 }
 0x34d   : > { %1929 = vst.msk [vmem:[%s3921_s20 + $0xf0] sm:$0xff] %vm1496_vm10, %v1897_v47 }
 0x34e   : > { %1913 = vst.msk [vmem:[%s3921_s20 + $0x70] sm:$0xff] %vm1496_vm10, %v1881_v11 }
 0x34f PF: > { %s13_s14 = sadd.s32 1, %s2248_s14   ;;  %s4379_s12 = smov %s2244_s13 }
 0x350   : > { %p10_p5 = scmp.ge.s32.totalorder %s13_s14, 4   ;;  %s4380_s13 = smov %s4382_s15 }
 0x352   :  { %12 = sbr.rel (!%p10_p5) target bundleno = 2 (0x2), region = 62 }

</bundles_post_ra>
